<compile_context>
chip_gen: v5e
topology: v5e:2x2
jax: 0.10.0
libtpu: 0.0.40
codegen_flags: <defaults>
</compile_context>

<pallas_src>
import jax
import jax.numpy as jnp
from jax.experimental import pallas as pl
from jax.experimental.pallas import tpu as pltpu

# ----------------------------- model config ---------------------------------
VOCAB = 100
B, S = 2, 8            # batch, sequence length
H = 128                # hidden size (lane-aligned)
NH, HD = 4, 32         # num heads, head dim
FF = 256               # feed-forward intermediate size
LAYERS = 2
NUM_LABELS = 3
LN_EPS = 1e-12
LANE = 128             # TPU lane width (padded I/O)


# ----------------------------- kernel helpers --------------------------------
def _layernorm(x, g, b):
    mu = jnp.mean(x, axis=-1, keepdims=True)
    var = jnp.mean((x - mu) ** 2, axis=-1, keepdims=True)
    return (x - mu) * jax.lax.rsqrt(var + LN_EPS) * g + b


def _gelu(x):
    # tanh approximation of GELU (EUP-friendly).
    # TODO(synk): HuggingFace BERT default is exact erf GELU; tiny numeric drift.
    c = 0.7978845608028654  # sqrt(2/pi)
    return 0.5 * x * (1.0 + jnp.tanh(c * (x + 0.044715 * x * x * x)))


# ----------------------------- fused kernel ----------------------------------
def fused_kernel(x_emb_ref, bias_ref, eg_ref, eb_ref,
                 wq_ref, bq_ref, wk_ref, bk_ref, wv_ref, bv_ref,
                 wo_ref, bo_ref, ln1g_ref, ln1b_ref,
                 w1_ref, b1_ref, w2_ref, b2_ref, ln2g_ref, ln2b_ref,
                 clsw_ref, clsb_ref,
                 logits_ref,
                 x_scr):
    layer = pl.program_id(0)

    # ---- embeddings LayerNorm: first grid step only ----
    @pl.when(layer == 0)
    def _():
        x_scr[...] = _layernorm(x_emb_ref[...], eg_ref[...], eb_ref[...])

    x = x_scr[...]                               # (B*S, H) f32, carried across layers
    x_bf = x.astype(jnp.bfloat16)

    # additive attention-mask bias: lane-dense (B, LANE) input -> (B, 1, S)
    bias = bias_ref[...][:, :S].reshape(B, 1, S)

    # per-layer weight blocks (leading block dim of size 1 indexed away)
    wq, bq = wq_ref[0], bq_ref[0]                # (NH,H,HD) bf16, (NH,1,HD) f32
    wk, bk = wk_ref[0], bk_ref[0]
    wv, bv = wv_ref[0], bv_ref[0]
    wo, bo = wo_ref[0], bo_ref[0]                # (NH,HD,H) bf16, (1,H) f32
    ln1g, ln1b = ln1g_ref[0], ln1b_ref[0]        # (1,H)
    w1, b1 = w1_ref[0], b1_ref[0]                # (H,FF) bf16, (1,FF)
    w2, b2 = w2_ref[0], b2_ref[0]                # (FF,H) bf16, (1,H)
    ln2g, ln2b = ln2g_ref[0], ln2b_ref[0]

    # ---- multi-head self-attention (no lane slices / transposes / concat) ----
    scale = 1.0 / (HD ** 0.5)
    attn = jnp.zeros((B * S, H), jnp.float32)
    for h in range(NH):                          # NH=4, Python-unrolled
        q_h = jnp.dot(x_bf, wq[h], preferred_element_type=jnp.float32) + bq[h]
        k_h = jnp.dot(x_bf, wk[h], preferred_element_type=jnp.float32) + bk[h]
        v_h = jnp.dot(x_bf, wv[h], preferred_element_type=jnp.float32) + bv[h]
        q3 = q_h.reshape(B, S, HD).astype(jnp.bfloat16)   # leading-dim split only
        k3 = k_h.reshape(B, S, HD).astype(jnp.bfloat16)
        v3 = v_h.reshape(B, S, HD).astype(jnp.bfloat16)
        s = jnp.einsum('bqd,bkd->bqk', q3, k3,
                       preferred_element_type=jnp.float32) * scale
        s = s + bias                             # (B,S,S) + (B,1,S)
        m = jnp.max(s, axis=-1, keepdims=True)
        e = jnp.exp(s - m)
        denom = jnp.sum(e, axis=-1, keepdims=True)
        p = e * pl.reciprocal(denom, approx=True)          # divide on EUP
        ctx = jnp.einsum('bqk,bkd->bqd', p.astype(jnp.bfloat16), v3,
                         preferred_element_type=jnp.float32)  # (B,S,HD)
        # accumulate the output projection per head (replaces concat + big matmul)
        attn = attn + jnp.dot(ctx.reshape(B * S, HD).astype(jnp.bfloat16), wo[h],
                              preferred_element_type=jnp.float32)
    attn = attn + bo

    h1 = _layernorm(x + attn, ln1g, ln1b)

    # ---- feed-forward ----
    ff = jnp.dot(h1.astype(jnp.bfloat16), w1,
                 preferred_element_type=jnp.float32) + b1
    ff = _gelu(ff)
    ff = jnp.dot(ff.astype(jnp.bfloat16), w2,
                 preferred_element_type=jnp.float32) + b2
    h2 = _layernorm(h1 + ff, ln2g, ln2b)
    x_scr[...] = h2

    # ---- classifier: last grid step only, lane-dense (B, LANE) output ----
    @pl.when(layer == pl.num_programs(0) - 1)
    def _():
        cls = jnp.concatenate([h2[b * S:b * S + 1, :] for b in range(B)], axis=0)
        logits_ref[...] = (jnp.dot(cls.astype(jnp.bfloat16), clsw_ref[...],
                                   preferred_element_type=jnp.float32)
                           + clsb_ref[...])


# ----------------------------- pallas wrapper ---------------------------------
def _layer_spec(arr):
    shape = arr.shape
    return pl.BlockSpec((1,) + shape[1:],
                        lambda l, _n=len(shape): (l,) + (0,) * (_n - 1))


def _const_spec(arr):
    shape = arr.shape
    return pl.BlockSpec(shape, lambda l, _n=len(shape): (0,) * _n)


def kobert_fused_forward(x_emb, bias_pad, emb_ln_g, emb_ln_b, pk,
                         cls_w_pad, cls_b_pad):
    ordered = [
        x_emb, bias_pad, emb_ln_g, emb_ln_b,
        pk["wq"], pk["bq"], pk["wk"], pk["bk"], pk["wv"], pk["bv"],
        pk["wo"], pk["bo"], pk["ln1g"], pk["ln1b"],
        pk["w1"], pk["b1"], pk["w2"], pk["b2"], pk["ln2g"], pk["ln2b"],
        cls_w_pad, cls_b_pad,
    ]
    in_specs = ([_const_spec(a) for a in ordered[:4]]
                + [_layer_spec(a) for a in ordered[4:-2]]
                + [_const_spec(a) for a in ordered[-2:]])

    logits_pad = pl.pallas_call(
        fused_kernel,
        out_shape=jax.ShapeDtypeStruct((B, LANE), jnp.float32),
        grid_spec=pltpu.PrefetchScalarGridSpec(
            num_scalar_prefetch=0,
            grid=(LAYERS,),
            in_specs=in_specs,
            out_specs=pl.BlockSpec((B, LANE), lambda l: (0, 0)),
            scratch_shapes=[pltpu.VMEM((B * S, H), jnp.float32)],
        ),
        compiler_params=pltpu.CompilerParams(
            dimension_semantics=("arbitrary",)),   # layers are sequential
    )(*ordered)
    return logits_pad[:, :NUM_LABELS]


# ----------------------------- parameter init ---------------------------------
def init_params(key):
    std = 0.02
    ks = iter(jax.random.split(key, 4 + LAYERS * 6))
    p = {
        "word_emb": std * jax.random.normal(next(ks), (VOCAB, H), jnp.float32),
        "pos_emb":  std * jax.random.normal(next(ks), (S, H), jnp.float32),
        "type_emb": std * jax.random.normal(next(ks), (2, H), jnp.float32),
        "emb_ln_g": jnp.ones((1, H), jnp.float32),
        "emb_ln_b": jnp.zeros((1, H), jnp.float32),
        "cls_w":    std * jax.random.normal(next(ks), (H, NUM_LABELS), jnp.float32),
        "cls_b":    jnp.zeros((1, NUM_LABELS), jnp.float32),
        "layers": [],
    }
    for _ in range(LAYERS):
        lp = {
            "wq": std * jax.random.normal(next(ks), (H, H), jnp.float32),
            "bq": jnp.zeros((1, H), jnp.float32),
            "wk": std * jax.random.normal(next(ks), (H, H), jnp.float32),
            "bk": jnp.zeros((1, H), jnp.float32),
            "wv": std * jax.random.normal(next(ks), (H, H), jnp.float32),
            "bv": jnp.zeros((1, H), jnp.float32),
            "wo": std * jax.random.normal(next(ks), (H, H), jnp.float32),
            "bo": jnp.zeros((1, H), jnp.float32),
            "ln1g": jnp.ones((1, H), jnp.float32),
            "ln1b": jnp.zeros((1, H), jnp.float32),
            "w1": std * jax.random.normal(next(ks), (H, FF), jnp.float32),
            "b1": jnp.zeros((1, FF), jnp.float32),
            "w2": std * jax.random.normal(next(ks), (FF, H), jnp.float32),
            "b2": jnp.zeros((1, H), jnp.float32),
            "ln2g": jnp.ones((1, H), jnp.float32),
            "ln2b": jnp.zeros((1, H), jnp.float32),
        }
        p["layers"].append(lp)
    return p


def pack_params(params):
    """Stack per-layer weights on a LAYERS axis, split heads, cast matmul weights to bf16."""
    bf = jnp.bfloat16
    L = params["layers"]

    def split_in(w):    # (H,H) -> (NH,H,HD): head h = columns h*HD:(h+1)*HD
        return w.reshape(H, NH, HD).transpose(1, 0, 2)

    def split_bias(b):  # (1,H) -> (NH,1,HD)
        return b.reshape(NH, HD)[:, None, :]

    def split_out(w):   # (H,H) -> (NH,HD,H): head h = rows h*HD:(h+1)*HD
        return w.reshape(NH, HD, H)

    stack = lambda f, k: jnp.stack([f(lp[k]) for lp in L], axis=0)
    ident = lambda a: a

    pk = {
        "wq": stack(split_in, "wq").astype(bf), "bq": stack(split_bias, "bq"),
        "wk": stack(split_in, "wk").astype(bf), "bk": stack(split_bias, "bk"),
        "wv": stack(split_in, "wv").astype(bf), "bv": stack(split_bias, "bv"),
        "wo": stack(split_out, "wo").astype(bf), "bo": stack(ident, "bo"),
        "ln1g": stack(ident, "ln1g"), "ln1b": stack(ident, "ln1b"),
        "w1": stack(ident, "w1").astype(bf), "b1": stack(ident, "b1"),
        "w2": stack(ident, "w2").astype(bf), "b2": stack(ident, "b2"),
        "ln2g": stack(ident, "ln2g"), "ln2b": stack(ident, "ln2b"),
    }
    cls_w_pad = jnp.zeros((H, LANE), jnp.float32).at[:, :NUM_LABELS].set(
        params["cls_w"]).astype(bf)
    cls_b_pad = jnp.zeros((1, LANE), jnp.float32).at[:, :NUM_LABELS].set(
        params["cls_b"])
    return pk, cls_w_pad, cls_b_pad


# ----------------------------- forward -----------------------------------------
def kobert_classifier_forward(params, input_ids, attention_mask):
    # Embedding lookup (gather) stays in plain JAX (glue).
    ids = input_ids.reshape(-1)                                   # (B*S,)
    x_emb = (jnp.take(params["word_emb"], ids, axis=0)
             + jnp.tile(params["pos_emb"], (B, 1))
             + params["type_emb"][0][None, :])                    # (B*S, H)

    # BERT extended attention mask -> additive bias, padded lane-dense.
    bias = (1.0 - attention_mask.astype(jnp.float32)) * -1e9      # (B, S)
    bias_pad = jnp.zeros((B, LANE), jnp.float32).at[:, :S].set(bias)

    pk, cls_w_pad, cls_b_pad = pack_params(params)
    logits = kobert_fused_forward(x_emb, bias_pad,
                                  params["emb_ln_g"], params["emb_ln_b"],
                                  pk, cls_w_pad, cls_b_pad)
    return logits                                                 # labels=None path


# ----------------------------- main ---------------------------------------------
if __name__ == "__main__":
    key = jax.random.PRNGKey(0)
    k_param, k_ids = jax.random.split(key)
    params = init_params(k_param)

    input_ids = jax.random.randint(k_ids, (B, S), 0, VOCAB, dtype=jnp.int32)
    attention_mask = jnp.array([[1, 1, 1, 1, 1, 1, 0, 0],
                                [1, 1, 1, 1, 0, 0, 0, 0]], dtype=jnp.int32)

    logits = kobert_classifier_forward(params, input_ids, attention_mask)
    logits = jax.block_until_ready(logits)
    assert logits.shape == (B, NUM_LABELS) and logits.dtype == jnp.float32
    assert bool(jnp.all(jnp.isfinite(logits)))
    print("KERNEL_OK")
</pallas_src>

<mosaic_0001>
module attributes {stable_mosaic.version = 11 : i64} {
  func.func @fused_kernel(%arg0: i32, %arg1: memref<16x128xf32, #tpu.memory_space<vmem>>, %arg2: memref<2x128xf32, #tpu.memory_space<vmem>>, %arg3: memref<1x128xf32, #tpu.memory_space<vmem>>, %arg4: memref<1x128xf32, #tpu.memory_space<vmem>>, %arg5: memref<1x4x128x32xbf16, #tpu.memory_space<vmem>>, %arg6: memref<1x4x1x32xf32, #tpu.memory_space<vmem>>, %arg7: memref<1x4x128x32xbf16, #tpu.memory_space<vmem>>, %arg8: memref<1x4x1x32xf32, #tpu.memory_space<vmem>>, %arg9: memref<1x4x128x32xbf16, #tpu.memory_space<vmem>>, %arg10: memref<1x4x1x32xf32, #tpu.memory_space<vmem>>, %arg11: memref<1x4x32x128xbf16, #tpu.memory_space<vmem>>, %arg12: memref<1x1x128xf32, #tpu.memory_space<vmem>>, %arg13: memref<1x1x128xf32, #tpu.memory_space<vmem>>, %arg14: memref<1x1x128xf32, #tpu.memory_space<vmem>>, %arg15: memref<1x128x256xbf16, #tpu.memory_space<vmem>>, %arg16: memref<1x1x256xf32, #tpu.memory_space<vmem>>, %arg17: memref<1x256x128xbf16, #tpu.memory_space<vmem>>, %arg18: memref<1x1x128xf32, #tpu.memory_space<vmem>>, %arg19: memref<1x1x128xf32, #tpu.memory_space<vmem>>, %arg20: memref<1x1x128xf32, #tpu.memory_space<vmem>>, %arg21: memref<128x128xbf16, #tpu.memory_space<vmem>>, %arg22: memref<1x128xf32, #tpu.memory_space<vmem>>, %arg23: memref<2x128xf32, #tpu.memory_space<vmem>>, %arg24: memref<16x128xf32, #tpu.memory_space<vmem>>) attributes {dimension_semantics = [#tpu.dimension_semantics<arbitrary>], iteration_bounds = array<i64: 2>, scalar_prefetch = 0 : i64, scratch_operands = 1 : i64, tpu.core_type = #tpu.core_type<tc>, window_params = [{pipeline_mode = #tpu.pipeline_mode<synchronous>, transform_indices = @transform_0, window_bounds = array<i64: 16, 128>}, {pipeline_mode = #tpu.pipeline_mode<synchronous>, transform_indices = @transform_1, window_bounds = array<i64: 2, 128>}, {pipeline_mode = #tpu.pipeline_mode<synchronous>, transform_indices = @transform_2, window_bounds = array<i64: 1, 128>}, {pipeline_mode = #tpu.pipeline_mode<synchronous>, transform_indices = @transform_3, window_bounds = array<i64: 1, 128>}, {transform_indices = @transform_4, window_bounds = array<i64: 1, 4, 128, 32>}, {transform_indices = @transform_5, window_bounds = array<i64: 1, 4, 1, 32>}, {transform_indices = @transform_6, window_bounds = array<i64: 1, 4, 128, 32>}, {transform_indices = @transform_7, window_bounds = array<i64: 1, 4, 1, 32>}, {transform_indices = @transform_8, window_bounds = array<i64: 1, 4, 128, 32>}, {transform_indices = @transform_9, window_bounds = array<i64: 1, 4, 1, 32>}, {transform_indices = @transform_10, window_bounds = array<i64: 1, 4, 32, 128>}, {transform_indices = @transform_11, window_bounds = array<i64: 1, 1, 128>}, {transform_indices = @transform_12, window_bounds = array<i64: 1, 1, 128>}, {transform_indices = @transform_13, window_bounds = array<i64: 1, 1, 128>}, {transform_indices = @transform_14, window_bounds = array<i64: 1, 128, 256>}, {transform_indices = @transform_15, window_bounds = array<i64: 1, 1, 256>}, {transform_indices = @transform_16, window_bounds = array<i64: 1, 256, 128>}, {transform_indices = @transform_17, window_bounds = array<i64: 1, 1, 128>}, {transform_indices = @transform_18, window_bounds = array<i64: 1, 1, 128>}, {transform_indices = @transform_19, window_bounds = array<i64: 1, 1, 128>}, {pipeline_mode = #tpu.pipeline_mode<synchronous>, transform_indices = @transform_20, window_bounds = array<i64: 128, 128>}, {pipeline_mode = #tpu.pipeline_mode<synchronous>, transform_indices = @transform_21, window_bounds = array<i64: 1, 128>}, {pipeline_mode = #tpu.pipeline_mode<synchronous>, transform_indices = @transform_22, window_bounds = array<i64: 2, 128>}]} {
    %c0_i32 = arith.constant 0 : i32
    %0 = arith.cmpi eq, %arg0, %c0_i32 : i32
    %1 = arith.extui %0 : i1 to i32
    %c0_i32_0 = arith.constant 0 : i32
    %2 = arith.cmpi ne, %1, %c0_i32_0 : i32
    scf.if %2 {
      %c0_114 = arith.constant 0 : index
      %c0_115 = arith.constant 0 : index
      %314 = vector.load %arg1[%c0_114, %c0_115] : memref<16x128xf32, #tpu.memory_space<vmem>>, vector<16x128xf32>
      %c0_116 = arith.constant 0 : index
      %c0_117 = arith.constant 0 : index
      %315 = vector.load %arg3[%c0_116, %c0_117] : memref<1x128xf32, #tpu.memory_space<vmem>>, vector<1x128xf32>
      %c0_118 = arith.constant 0 : index
      %c0_119 = arith.constant 0 : index
      %316 = vector.load %arg4[%c0_118, %c0_119] : memref<1x128xf32, #tpu.memory_space<vmem>>, vector<1x128xf32>
      %cst_120 = arith.constant dense<0.000000e+00> : vector<16xf32>
      %317 = vector.multi_reduction <add>, %314, %cst_120 [1] : vector<16x128xf32> to vector<16xf32>
      %318 = vector.shape_cast %317 : vector<16xf32> to vector<16x1xf32>
      %cst_121 = arith.constant 1.280000e+02 : f32
      %319 = vector.broadcast %cst_121 : f32 to vector<16x1xf32>
      %320 = arith.divf %318, %319 : vector<16x1xf32>
      %321 = vector.broadcast %320 : vector<16x1xf32> to vector<16x128xf32>
      %322 = arith.subf %314, %321 : vector<16x128xf32>
      %323 = arith.mulf %322, %322 : vector<16x128xf32>
      %cst_122 = arith.constant dense<0.000000e+00> : vector<16xf32>
      %324 = vector.multi_reduction <add>, %323, %cst_122 [1] : vector<16x128xf32> to vector<16xf32>
      %325 = vector.shape_cast %324 : vector<16xf32> to vector<16x1xf32>
      %cst_123 = arith.constant 1.280000e+02 : f32
      %326 = vector.broadcast %cst_123 : f32 to vector<16x1xf32>
      %327 = arith.divf %325, %326 : vector<16x1xf32>
      %328 = vector.broadcast %320 : vector<16x1xf32> to vector<16x128xf32>
      %329 = arith.subf %314, %328 : vector<16x128xf32>
      %cst_124 = arith.constant 9.99999996E-13 : f32
      %330 = vector.broadcast %cst_124 : f32 to vector<16x1xf32>
      %331 = arith.addf %327, %330 : vector<16x1xf32>
      %332 = math.rsqrt %331 : vector<16x1xf32>
      %333 = vector.broadcast %332 : vector<16x1xf32> to vector<16x128xf32>
      %334 = arith.mulf %329, %333 : vector<16x128xf32>
      %335 = vector.broadcast %315 : vector<1x128xf32> to vector<16x128xf32>
      %336 = arith.mulf %334, %335 : vector<16x128xf32>
      %337 = vector.broadcast %316 : vector<1x128xf32> to vector<16x128xf32>
      %338 = arith.addf %336, %337 : vector<16x128xf32>
      %c0_125 = arith.constant 0 : index
      %c0_126 = arith.constant 0 : index
      %339 = vector.load %arg24[%c0_125, %c0_126] : memref<16x128xf32, #tpu.memory_space<vmem>>, vector<16x128xf32>
      tpu.vector_store %arg24[%c0_125, %c0_126], %338 {strides = array<i32>} : memref<16x128xf32, #tpu.memory_space<vmem>>, vector<16x128xf32>,
    } else {
    }
    %c0 = arith.constant 0 : index
    %c0_1 = arith.constant 0 : index
    %3 = vector.load %arg24[%c0, %c0_1] : memref<16x128xf32, #tpu.memory_space<vmem>>, vector<16x128xf32>
    %4 = arith.truncf %3 : vector<16x128xf32> to vector<16x128xbf16>
    %c0_2 = arith.constant 0 : index
    %c0_3 = arith.constant 0 : index
    %5 = vector.load %arg2[%c0_2, %c0_3] : memref<2x128xf32, #tpu.memory_space<vmem>>, vector<2x128xf32>
    %6 = vector.extract_strided_slice %5 {offsets = [0, 0], sizes = [2, 8], strides = [1, 1]} : vector<2x128xf32> to vector<2x8xf32>
    %7 = vector.shape_cast %6 : vector<2x8xf32> to vector<2x1x8xf32>
    %c0_4 = arith.constant 0 : index
    %c0_5 = arith.constant 0 : index
    %c0_6 = arith.constant 0 : index
    %c0_7 = arith.constant 0 : index
    %8 = vector.load %arg5[%c0_4, %c0_5, %c0_6, %c0_7] : memref<1x4x128x32xbf16, #tpu.memory_space<vmem>>, vector<1x4x128x32xbf16>
    %9 = vector.shape_cast %8 : vector<1x4x128x32xbf16> to vector<4x128x32xbf16>
    %c0_8 = arith.constant 0 : index
    %c0_9 = arith.constant 0 : index
    %c0_10 = arith.constant 0 : index
    %c0_11 = arith.constant 0 : index
    %10 = vector.load %arg6[%c0_8, %c0_9, %c0_10, %c0_11] : memref<1x4x1x32xf32, #tpu.memory_space<vmem>>, vector<1x4x1x32xf32>
    %11 = vector.shape_cast %10 : vector<1x4x1x32xf32> to vector<4x1x32xf32>
    %c0_12 = arith.constant 0 : index
    %c0_13 = arith.constant 0 : index
    %c0_14 = arith.constant 0 : index
    %c0_15 = arith.constant 0 : index
    %12 = vector.load %arg7[%c0_12, %c0_13, %c0_14, %c0_15] : memref<1x4x128x32xbf16, #tpu.memory_space<vmem>>, vector<1x4x128x32xbf16>
    %13 = vector.shape_cast %12 : vector<1x4x128x32xbf16> to vector<4x128x32xbf16>
    %c0_16 = arith.constant 0 : index
    %c0_17 = arith.constant 0 : index
    %c0_18 = arith.constant 0 : index
    %c0_19 = arith.constant 0 : index
    %14 = vector.load %arg8[%c0_16, %c0_17, %c0_18, %c0_19] : memref<1x4x1x32xf32, #tpu.memory_space<vmem>>, vector<1x4x1x32xf32>
    %15 = vector.shape_cast %14 : vector<1x4x1x32xf32> to vector<4x1x32xf32>
    %c0_20 = arith.constant 0 : index
    %c0_21 = arith.constant 0 : index
    %c0_22 = arith.constant 0 : index
    %c0_23 = arith.constant 0 : index
    %16 = vector.load %arg9[%c0_20, %c0_21, %c0_22, %c0_23] : memref<1x4x128x32xbf16, #tpu.memory_space<vmem>>, vector<1x4x128x32xbf16>
    %17 = vector.shape_cast %16 : vector<1x4x128x32xbf16> to vector<4x128x32xbf16>
    %c0_24 = arith.constant 0 : index
    %c0_25 = arith.constant 0 : index
    %c0_26 = arith.constant 0 : index
    %c0_27 = arith.constant 0 : index
    %18 = vector.load %arg10[%c0_24, %c0_25, %c0_26, %c0_27] : memref<1x4x1x32xf32, #tpu.memory_space<vmem>>, vector<1x4x1x32xf32>
    %19 = vector.shape_cast %18 : vector<1x4x1x32xf32> to vector<4x1x32xf32>
    %c0_28 = arith.constant 0 : index
    %c0_29 = arith.constant 0 : index
    %c0_30 = arith.constant 0 : index
    %c0_31 = arith.constant 0 : index
    %20 = vector.load %arg11[%c0_28, %c0_29, %c0_30, %c0_31] : memref<1x4x32x128xbf16, #tpu.memory_space<vmem>>, vector<1x4x32x128xbf16>
    %21 = vector.shape_cast %20 : vector<1x4x32x128xbf16> to vector<4x32x128xbf16>
    %c0_32 = arith.constant 0 : index
    %c0_33 = arith.constant 0 : index
    %c0_34 = arith.constant 0 : index
    %22 = vector.load %arg12[%c0_32, %c0_33, %c0_34] : memref<1x1x128xf32, #tpu.memory_space<vmem>>, vector<1x1x128xf32>
    %23 = vector.shape_cast %22 : vector<1x1x128xf32> to vector<1x128xf32>
    %c0_35 = arith.constant 0 : index
    %c0_36 = arith.constant 0 : index
    %c0_37 = arith.constant 0 : index
    %24 = vector.load %arg13[%c0_35, %c0_36, %c0_37] : memref<1x1x128xf32, #tpu.memory_space<vmem>>, vector<1x1x128xf32>
    %25 = vector.shape_cast %24 : vector<1x1x128xf32> to vector<1x128xf32>
    %c0_38 = arith.constant 0 : index
    %c0_39 = arith.constant 0 : index
    %c0_40 = arith.constant 0 : index
    %26 = vector.load %arg14[%c0_38, %c0_39, %c0_40] : memref<1x1x128xf32, #tpu.memory_space<vmem>>, vector<1x1x128xf32>
    %27 = vector.shape_cast %26 : vector<1x1x128xf32> to vector<1x128xf32>
    %c0_41 = arith.constant 0 : index
    %c0_42 = arith.constant 0 : index
    %c0_43 = arith.constant 0 : index
    %28 = vector.load %arg15[%c0_41, %c0_42, %c0_43] : memref<1x128x256xbf16, #tpu.memory_space<vmem>>, vector<1x128x256xbf16>
    %29 = vector.shape_cast %28 : vector<1x128x256xbf16> to vector<128x256xbf16>
    %c0_44 = arith.constant 0 : index
    %c0_45 = arith.constant 0 : index
    %c0_46 = arith.constant 0 : index
    %30 = vector.load %arg16[%c0_44, %c0_45, %c0_46] : memref<1x1x256xf32, #tpu.memory_space<vmem>>, vector<1x1x256xf32>
    %31 = vector.shape_cast %30 : vector<1x1x256xf32> to vector<1x256xf32>
    %c0_47 = arith.constant 0 : index
    %c0_48 = arith.constant 0 : index
    %c0_49 = arith.constant 0 : index
    %32 = vector.load %arg17[%c0_47, %c0_48, %c0_49] : memref<1x256x128xbf16, #tpu.memory_space<vmem>>, vector<1x256x128xbf16>
    %33 = vector.shape_cast %32 : vector<1x256x128xbf16> to vector<256x128xbf16>
    %c0_50 = arith.constant 0 : index
    %c0_51 = arith.constant 0 : index
    %c0_52 = arith.constant 0 : index
    %34 = vector.load %arg18[%c0_50, %c0_51, %c0_52] : memref<1x1x128xf32, #tpu.memory_space<vmem>>, vector<1x1x128xf32>
    %35 = vector.shape_cast %34 : vector<1x1x128xf32> to vector<1x128xf32>
    %c0_53 = arith.constant 0 : index
    %c0_54 = arith.constant 0 : index
    %c0_55 = arith.constant 0 : index
    %36 = vector.load %arg19[%c0_53, %c0_54, %c0_55] : memref<1x1x128xf32, #tpu.memory_space<vmem>>, vector<1x1x128xf32>
    %37 = vector.shape_cast %36 : vector<1x1x128xf32> to vector<1x128xf32>
    %c0_56 = arith.constant 0 : index
    %c0_57 = arith.constant 0 : index
    %c0_58 = arith.constant 0 : index
    %38 = vector.load %arg20[%c0_56, %c0_57, %c0_58] : memref<1x1x128xf32, #tpu.memory_space<vmem>>, vector<1x1x128xf32>
    %39 = vector.shape_cast %38 : vector<1x1x128xf32> to vector<1x128xf32>
    %cst = arith.constant 0.000000e+00 : f32
    %40 = vector.broadcast %cst : f32 to vector<16x128xf32>
    %41 = vector.extract_strided_slice %9 {offsets = [0, 0, 0], sizes = [1, 128, 32], strides = [1, 1, 1]} : vector<4x128x32xbf16> to vector<1x128x32xbf16>
    %42 = vector.shape_cast %41 : vector<1x128x32xbf16> to vector<128x32xbf16>
    %cst_59 = arith.constant dense<0.000000e+00> : vector<16x32xf32>
    %43 = tpu.matmul %4, %42, %cst_59 {dimension_numbers = #tpu.dot_dimension_numbers<[1], [0], [0], [1], [0, 0, 1, 1], [], []>} : vector<16x128xbf16>, vector<128x32xbf16>, vector<16x32xf32> -> vector<16x32xf32>
    %44 = vector.extract_strided_slice %11 {offsets = [0, 0, 0], sizes = [1, 1, 32], strides = [1, 1, 1]} : vector<4x1x32xf32> to vector<1x1x32xf32>
    %45 = vector.shape_cast %44 : vector<1x1x32xf32> to vector<1x32xf32>
    %46 = vector.broadcast %45 : vector<1x32xf32> to vector<16x32xf32>
    %47 = arith.addf %43, %46 : vector<16x32xf32>
    %48 = vector.extract_strided_slice %13 {offsets = [0, 0, 0], sizes = [1, 128, 32], strides = [1, 1, 1]} : vector<4x128x32xbf16> to vector<1x128x32xbf16>
    %49 = vector.shape_cast %48 : vector<1x128x32xbf16> to vector<128x32xbf16>
    %cst_60 = arith.constant dense<0.000000e+00> : vector<16x32xf32>
    %50 = tpu.matmul %4, %49, %cst_60 {dimension_numbers = #tpu.dot_dimension_numbers<[1], [0], [0], [1], [0, 0, 1, 1], [], []>} : vector<16x128xbf16>, vector<128x32xbf16>, vector<16x32xf32> -> vector<16x32xf32>
    %51 = vector.extract_strided_slice %15 {offsets = [0, 0, 0], sizes = [1, 1, 32], strides = [1, 1, 1]} : vector<4x1x32xf32> to vector<1x1x32xf32>
    %52 = vector.shape_cast %51 : vector<1x1x32xf32> to vector<1x32xf32>
    %53 = vector.broadcast %52 : vector<1x32xf32> to vector<16x32xf32>
    %54 = arith.addf %50, %53 : vector<16x32xf32>
    %55 = vector.extract_strided_slice %17 {offsets = [0, 0, 0], sizes = [1, 128, 32], strides = [1, 1, 1]} : vector<4x128x32xbf16> to vector<1x128x32xbf16>
    %56 = vector.shape_cast %55 : vector<1x128x32xbf16> to vector<128x32xbf16>
    %cst_61 = arith.constant dense<0.000000e+00> : vector<16x32xf32>
    %57 = tpu.matmul %4, %56, %cst_61 {dimension_numbers = #tpu.dot_dimension_numbers<[1], [0], [0], [1], [0, 0, 1, 1], [], []>} : vector<16x128xbf16>, vector<128x32xbf16>, vector<16x32xf32> -> vector<16x32xf32>
    %58 = vector.extract_strided_slice %19 {offsets = [0, 0, 0], sizes = [1, 1, 32], strides = [1, 1, 1]} : vector<4x1x32xf32> to vector<1x1x32xf32>
    %59 = vector.shape_cast %58 : vector<1x1x32xf32> to vector<1x32xf32>
    %60 = vector.broadcast %59 : vector<1x32xf32> to vector<16x32xf32>
    %61 = arith.addf %57, %60 : vector<16x32xf32>
    %62 = vector.shape_cast %47 : vector<16x32xf32> to vector<2x8x32xf32>
    %63 = arith.truncf %62 : vector<2x8x32xf32> to vector<2x8x32xbf16>
    %64 = vector.shape_cast %54 : vector<16x32xf32> to vector<2x8x32xf32>
    %65 = arith.truncf %64 : vector<2x8x32xf32> to vector<2x8x32xbf16>
    %66 = vector.shape_cast %61 : vector<16x32xf32> to vector<2x8x32xf32>
    %67 = arith.truncf %66 : vector<2x8x32xf32> to vector<2x8x32xbf16>
    "tpu.trace_start"() <{level = 10 : i32, message = "bqd,bkd->bqk"}> : () -> ()
    %cst_62 = arith.constant dense<0.000000e+00> : vector<2x8x8xf32>
    %68 = tpu.matmul %63, %65, %cst_62 {dimension_numbers = #tpu.dot_dimension_numbers<[2], [2], [1], [1], [0, 0, 0, 1, 1, 1], [0], [0]>} : vector<2x8x32xbf16>, vector<2x8x32xbf16>, vector<2x8x8xf32> -> vector<2x8x8xf32>
    "tpu.trace_stop"() : () -> ()
    %cst_63 = arith.constant 0.176776692 : f32
    %69 = vector.broadcast %cst_63 : f32 to vector<2x8x8xf32>
    %70 = arith.mulf %68, %69 : vector<2x8x8xf32>
    %71 = vector.broadcast %7 : vector<2x1x8xf32> to vector<2x8x8xf32>
    %72 = arith.addf %70, %71 : vector<2x8x8xf32>
    %cst_64 = arith.constant dense<0xFF800000> : vector<2x8xf32>
    %73 = vector.multi_reduction <maximumf>, %72, %cst_64 [2] : vector<2x8x8xf32> to vector<2x8xf32>
    %74 = vector.shape_cast %73 : vector<2x8xf32> to vector<2x8x1xf32>
    %75 = vector.broadcast %74 : vector<2x8x1xf32> to vector<2x8x8xf32>
    %76 = arith.subf %72, %75 : vector<2x8x8xf32>
    %77 = math.exp %76 : vector<2x8x8xf32>
    %cst_65 = arith.constant dense<0.000000e+00> : vector<2x8xf32>
    %78 = vector.multi_reduction <add>, %77, %cst_65 [2] : vector<2x8x8xf32> to vector<2x8xf32>
    %79 = vector.shape_cast %78 : vector<2x8xf32> to vector<2x8x1xf32>
    %80 = tpu.reciprocal %79 {approx = true} : vector<2x8x1xf32> -> vector<2x8x1xf32>
    %81 = vector.broadcast %80 : vector<2x8x1xf32> to vector<2x8x8xf32>
    %82 = arith.mulf %77, %81 : vector<2x8x8xf32>
    %83 = arith.truncf %82 : vector<2x8x8xf32> to vector<2x8x8xbf16>
    "tpu.trace_start"() <{level = 10 : i32, message = "bqk,bkd->bqd"}> : () -> ()
    %cst_66 = arith.constant dense<0.000000e+00> : vector<2x8x32xf32>
    %84 = tpu.matmul %83, %67, %cst_66 {dimension_numbers = #tpu.dot_dimension_numbers<[2], [1], [1], [2], [0, 0, 0, 1, 1, 2], [0], [0]>} : vector<2x8x8xbf16>, vector<2x8x32xbf16>, vector<2x8x32xf32> -> vector<2x8x32xf32>
    "tpu.trace_stop"() : () -> ()
    %85 = vector.shape_cast %84 : vector<2x8x32xf32> to vector<16x32xf32>
    %86 = arith.truncf %85 : vector<16x32xf32> to vector<16x32xbf16>
    %87 = vector.extract_strided_slice %21 {offsets = [0, 0, 0], sizes = [1, 32, 128], strides = [1, 1, 1]} : vector<4x32x128xbf16> to vector<1x32x128xbf16>
    %88 = vector.shape_cast %87 : vector<1x32x128xbf16> to vector<32x128xbf16>
    %cst_67 = arith.constant dense<0.000000e+00> : vector<16x128xf32>
    %89 = tpu.matmul %86, %88, %cst_67 {dimension_numbers = #tpu.dot_dimension_numbers<[1], [0], [0], [1], [0, 0, 1, 1], [], []>} : vector<16x32xbf16>, vector<32x128xbf16>, vector<16x128xf32> -> vector<16x128xf32>
    %90 = arith.addf %40, %89 : vector<16x128xf32>
    %91 = vector.extract_strided_slice %9 {offsets = [1, 0, 0], sizes = [1, 128, 32], strides = [1, 1, 1]} : vector<4x128x32xbf16> to vector<1x128x32xbf16>
    %92 = vector.shape_cast %91 : vector<1x128x32xbf16> to vector<128x32xbf16>
    %cst_68 = arith.constant dense<0.000000e+00> : vector<16x32xf32>
    %93 = tpu.matmul %4, %92, %cst_68 {dimension_numbers = #tpu.dot_dimension_numbers<[1], [0], [0], [1], [0, 0, 1, 1], [], []>} : vector<16x128xbf16>, vector<128x32xbf16>, vector<16x32xf32> -> vector<16x32xf32>
    %94 = vector.extract_strided_slice %11 {offsets = [1, 0, 0], sizes = [1, 1, 32], strides = [1, 1, 1]} : vector<4x1x32xf32> to vector<1x1x32xf32>
    %95 = vector.shape_cast %94 : vector<1x1x32xf32> to vector<1x32xf32>
    %96 = vector.broadcast %95 : vector<1x32xf32> to vector<16x32xf32>
    %97 = arith.addf %93, %96 : vector<16x32xf32>
    %98 = vector.extract_strided_slice %13 {offsets = [1, 0, 0], sizes = [1, 128, 32], strides = [1, 1, 1]} : vector<4x128x32xbf16> to vector<1x128x32xbf16>
    %99 = vector.shape_cast %98 : vector<1x128x32xbf16> to vector<128x32xbf16>
    %cst_69 = arith.constant dense<0.000000e+00> : vector<16x32xf32>
    %100 = tpu.matmul %4, %99, %cst_69 {dimension_numbers = #tpu.dot_dimension_numbers<[1], [0], [0], [1], [0, 0, 1, 1], [], []>} : vector<16x128xbf16>, vector<128x32xbf16>, vector<16x32xf32> -> vector<16x32xf32>
    %101 = vector.extract_strided_slice %15 {offsets = [1, 0, 0], sizes = [1, 1, 32], strides = [1, 1, 1]} : vector<4x1x32xf32> to vector<1x1x32xf32>
    %102 = vector.shape_cast %101 : vector<1x1x32xf32> to vector<1x32xf32>
    %103 = vector.broadcast %102 : vector<1x32xf32> to vector<16x32xf32>
    %104 = arith.addf %100, %103 : vector<16x32xf32>
    %105 = vector.extract_strided_slice %17 {offsets = [1, 0, 0], sizes = [1, 128, 32], strides = [1, 1, 1]} : vector<4x128x32xbf16> to vector<1x128x32xbf16>
    %106 = vector.shape_cast %105 : vector<1x128x32xbf16> to vector<128x32xbf16>
    %cst_70 = arith.constant dense<0.000000e+00> : vector<16x32xf32>
    %107 = tpu.matmul %4, %106, %cst_70 {dimension_numbers = #tpu.dot_dimension_numbers<[1], [0], [0], [1], [0, 0, 1, 1], [], []>} : vector<16x128xbf16>, vector<128x32xbf16>, vector<16x32xf32> -> vector<16x32xf32>
    %108 = vector.extract_strided_slice %19 {offsets = [1, 0, 0], sizes = [1, 1, 32], strides = [1, 1, 1]} : vector<4x1x32xf32> to vector<1x1x32xf32>
    %109 = vector.shape_cast %108 : vector<1x1x32xf32> to vector<1x32xf32>
    %110 = vector.broadcast %109 : vector<1x32xf32> to vector<16x32xf32>
    %111 = arith.addf %107, %110 : vector<16x32xf32>
    %112 = vector.shape_cast %97 : vector<16x32xf32> to vector<2x8x32xf32>
    %113 = arith.truncf %112 : vector<2x8x32xf32> to vector<2x8x32xbf16>
    %114 = vector.shape_cast %104 : vector<16x32xf32> to vector<2x8x32xf32>
    %115 = arith.truncf %114 : vector<2x8x32xf32> to vector<2x8x32xbf16>
    %116 = vector.shape_cast %111 : vector<16x32xf32> to vector<2x8x32xf32>
    %117 = arith.truncf %116 : vector<2x8x32xf32> to vector<2x8x32xbf16>
    "tpu.trace_start"() <{level = 10 : i32, message = "bqd,bkd->bqk"}> : () -> ()
    %cst_71 = arith.constant dense<0.000000e+00> : vector<2x8x8xf32>
    %118 = tpu.matmul %113, %115, %cst_71 {dimension_numbers = #tpu.dot_dimension_numbers<[2], [2], [1], [1], [0, 0, 0, 1, 1, 1], [0], [0]>} : vector<2x8x32xbf16>, vector<2x8x32xbf16>, vector<2x8x8xf32> -> vector<2x8x8xf32>
    "tpu.trace_stop"() : () -> ()
    %cst_72 = arith.constant 0.176776692 : f32
    %119 = vector.broadcast %cst_72 : f32 to vector<2x8x8xf32>
    %120 = arith.mulf %118, %119 : vector<2x8x8xf32>
    %121 = vector.broadcast %7 : vector<2x1x8xf32> to vector<2x8x8xf32>
    %122 = arith.addf %120, %121 : vector<2x8x8xf32>
    %cst_73 = arith.constant dense<0xFF800000> : vector<2x8xf32>
    %123 = vector.multi_reduction <maximumf>, %122, %cst_73 [2] : vector<2x8x8xf32> to vector<2x8xf32>
    %124 = vector.shape_cast %123 : vector<2x8xf32> to vector<2x8x1xf32>
    %125 = vector.broadcast %124 : vector<2x8x1xf32> to vector<2x8x8xf32>
    %126 = arith.subf %122, %125 : vector<2x8x8xf32>
    %127 = math.exp %126 : vector<2x8x8xf32>
    %cst_74 = arith.constant dense<0.000000e+00> : vector<2x8xf32>
    %128 = vector.multi_reduction <add>, %127, %cst_74 [2] : vector<2x8x8xf32> to vector<2x8xf32>
    %129 = vector.shape_cast %128 : vector<2x8xf32> to vector<2x8x1xf32>
    %130 = tpu.reciprocal %129 {approx = true} : vector<2x8x1xf32> -> vector<2x8x1xf32>
    %131 = vector.broadcast %130 : vector<2x8x1xf32> to vector<2x8x8xf32>
    %132 = arith.mulf %127, %131 : vector<2x8x8xf32>
    %133 = arith.truncf %132 : vector<2x8x8xf32> to vector<2x8x8xbf16>
    "tpu.trace_start"() <{level = 10 : i32, message = "bqk,bkd->bqd"}> : () -> ()
    %cst_75 = arith.constant dense<0.000000e+00> : vector<2x8x32xf32>
    %134 = tpu.matmul %133, %117, %cst_75 {dimension_numbers = #tpu.dot_dimension_numbers<[2], [1], [1], [2], [0, 0, 0, 1, 1, 2], [0], [0]>} : vector<2x8x8xbf16>, vector<2x8x32xbf16>, vector<2x8x32xf32> -> vector<2x8x32xf32>
    "tpu.trace_stop"() : () -> ()
    %135 = vector.shape_cast %134 : vector<2x8x32xf32> to vector<16x32xf32>
    %136 = arith.truncf %135 : vector<16x32xf32> to vector<16x32xbf16>
    %137 = vector.extract_strided_slice %21 {offsets = [1, 0, 0], sizes = [1, 32, 128], strides = [1, 1, 1]} : vector<4x32x128xbf16> to vector<1x32x128xbf16>
    %138 = vector.shape_cast %137 : vector<1x32x128xbf16> to vector<32x128xbf16>
    %cst_76 = arith.constant dense<0.000000e+00> : vector<16x128xf32>
    %139 = tpu.matmul %136, %138, %cst_76 {dimension_numbers = #tpu.dot_dimension_numbers<[1], [0], [0], [1], [0, 0, 1, 1], [], []>} : vector<16x32xbf16>, vector<32x128xbf16>, vector<16x128xf32> -> vector<16x128xf32>
    %140 = arith.addf %90, %139 : vector<16x128xf32>
    %141 = vector.extract_strided_slice %9 {offsets = [2, 0, 0], sizes = [1, 128, 32], strides = [1, 1, 1]} : vector<4x128x32xbf16> to vector<1x128x32xbf16>
    %142 = vector.shape_cast %141 : vector<1x128x32xbf16> to vector<128x32xbf16>
    %cst_77 = arith.constant dense<0.000000e+00> : vector<16x32xf32>
    %143 = tpu.matmul %4, %142, %cst_77 {dimension_numbers = #tpu.dot_dimension_numbers<[1], [0], [0], [1], [0, 0, 1, 1], [], []>} : vector<16x128xbf16>, vector<128x32xbf16>, vector<16x32xf32> -> vector<16x32xf32>
    %144 = vector.extract_strided_slice %11 {offsets = [2, 0, 0], sizes = [1, 1, 32], strides = [1, 1, 1]} : vector<4x1x32xf32> to vector<1x1x32xf32>
    %145 = vector.shape_cast %144 : vector<1x1x32xf32> to vector<1x32xf32>
    %146 = vector.broadcast %145 : vector<1x32xf32> to vector<16x32xf32>
    %147 = arith.addf %143, %146 : vector<16x32xf32>
    %148 = vector.extract_strided_slice %13 {offsets = [2, 0, 0], sizes = [1, 128, 32], strides = [1, 1, 1]} : vector<4x128x32xbf16> to vector<1x128x32xbf16>
    %149 = vector.shape_cast %148 : vector<1x128x32xbf16> to vector<128x32xbf16>
    %cst_78 = arith.constant dense<0.000000e+00> : vector<16x32xf32>
    %150 = tpu.matmul %4, %149, %cst_78 {dimension_numbers = #tpu.dot_dimension_numbers<[1], [0], [0], [1], [0, 0, 1, 1], [], []>} : vector<16x128xbf16>, vector<128x32xbf16>, vector<16x32xf32> -> vector<16x32xf32>
    %151 = vector.extract_strided_slice %15 {offsets = [2, 0, 0], sizes = [1, 1, 32], strides = [1, 1, 1]} : vector<4x1x32xf32> to vector<1x1x32xf32>
    %152 = vector.shape_cast %151 : vector<1x1x32xf32> to vector<1x32xf32>
    %153 = vector.broadcast %152 : vector<1x32xf32> to vector<16x32xf32>
    %154 = arith.addf %150, %153 : vector<16x32xf32>
    %155 = vector.extract_strided_slice %17 {offsets = [2, 0, 0], sizes = [1, 128, 32], strides = [1, 1, 1]} : vector<4x128x32xbf16> to vector<1x128x32xbf16>
    %156 = vector.shape_cast %155 : vector<1x128x32xbf16> to vector<128x32xbf16>
    %cst_79 = arith.constant dense<0.000000e+00> : vector<16x32xf32>
    %157 = tpu.matmul %4, %156, %cst_79 {dimension_numbers = #tpu.dot_dimension_numbers<[1], [0], [0], [1], [0, 0, 1, 1], [], []>} : vector<16x128xbf16>, vector<128x32xbf16>, vector<16x32xf32> -> vector<16x32xf32>
    %158 = vector.extract_strided_slice %19 {offsets = [2, 0, 0], sizes = [1, 1, 32], strides = [1, 1, 1]} : vector<4x1x32xf32> to vector<1x1x32xf32>
    %159 = vector.shape_cast %158 : vector<1x1x32xf32> to vector<1x32xf32>
    %160 = vector.broadcast %159 : vector<1x32xf32> to vector<16x32xf32>
    %161 = arith.addf %157, %160 : vector<16x32xf32>
    %162 = vector.shape_cast %147 : vector<16x32xf32> to vector<2x8x32xf32>
    %163 = arith.truncf %162 : vector<2x8x32xf32> to vector<2x8x32xbf16>
    %164 = vector.shape_cast %154 : vector<16x32xf32> to vector<2x8x32xf32>
    %165 = arith.truncf %164 : vector<2x8x32xf32> to vector<2x8x32xbf16>
    %166 = vector.shape_cast %161 : vector<16x32xf32> to vector<2x8x32xf32>
    %167 = arith.truncf %166 : vector<2x8x32xf32> to vector<2x8x32xbf16>
    "tpu.trace_start"() <{level = 10 : i32, message = "bqd,bkd->bqk"}> : () -> ()
    %cst_80 = arith.constant dense<0.000000e+00> : vector<2x8x8xf32>
    %168 = tpu.matmul %163, %165, %cst_80 {dimension_numbers = #tpu.dot_dimension_numbers<[2], [2], [1], [1], [0, 0, 0, 1, 1, 1], [0], [0]>} : vector<2x8x32xbf16>, vector<2x8x32xbf16>, vector<2x8x8xf32> -> vector<2x8x8xf32>
    "tpu.trace_stop"() : () -> ()
    %cst_81 = arith.constant 0.176776692 : f32
    %169 = vector.broadcast %cst_81 : f32 to vector<2x8x8xf32>
    %170 = arith.mulf %168, %169 : vector<2x8x8xf32>
    %171 = vector.broadcast %7 : vector<2x1x8xf32> to vector<2x8x8xf32>
    %172 = arith.addf %170, %171 : vector<2x8x8xf32>
    %cst_82 = arith.constant dense<0xFF800000> : vector<2x8xf32>
    %173 = vector.multi_reduction <maximumf>, %172, %cst_82 [2] : vector<2x8x8xf32> to vector<2x8xf32>
    %174 = vector.shape_cast %173 : vector<2x8xf32> to vector<2x8x1xf32>
    %175 = vector.broadcast %174 : vector<2x8x1xf32> to vector<2x8x8xf32>
    %176 = arith.subf %172, %175 : vector<2x8x8xf32>
    %177 = math.exp %176 : vector<2x8x8xf32>
    %cst_83 = arith.constant dense<0.000000e+00> : vector<2x8xf32>
    %178 = vector.multi_reduction <add>, %177, %cst_83 [2] : vector<2x8x8xf32> to vector<2x8xf32>
    %179 = vector.shape_cast %178 : vector<2x8xf32> to vector<2x8x1xf32>
    %180 = tpu.reciprocal %179 {approx = true} : vector<2x8x1xf32> -> vector<2x8x1xf32>
    %181 = vector.broadcast %180 : vector<2x8x1xf32> to vector<2x8x8xf32>
    %182 = arith.mulf %177, %181 : vector<2x8x8xf32>
    %183 = arith.truncf %182 : vector<2x8x8xf32> to vector<2x8x8xbf16>
    "tpu.trace_start"() <{level = 10 : i32, message = "bqk,bkd->bqd"}> : () -> ()
    %cst_84 = arith.constant dense<0.000000e+00> : vector<2x8x32xf32>
    %184 = tpu.matmul %183, %167, %cst_84 {dimension_numbers = #tpu.dot_dimension_numbers<[2], [1], [1], [2], [0, 0, 0, 1, 1, 2], [0], [0]>} : vector<2x8x8xbf16>, vector<2x8x32xbf16>, vector<2x8x32xf32> -> vector<2x8x32xf32>
    "tpu.trace_stop"() : () -> ()
    %185 = vector.shape_cast %184 : vector<2x8x32xf32> to vector<16x32xf32>
    %186 = arith.truncf %185 : vector<16x32xf32> to vector<16x32xbf16>
    %187 = vector.extract_strided_slice %21 {offsets = [2, 0, 0], sizes = [1, 32, 128], strides = [1, 1, 1]} : vector<4x32x128xbf16> to vector<1x32x128xbf16>
    %188 = vector.shape_cast %187 : vector<1x32x128xbf16> to vector<32x128xbf16>
    %cst_85 = arith.constant dense<0.000000e+00> : vector<16x128xf32>
    %189 = tpu.matmul %186, %188, %cst_85 {dimension_numbers = #tpu.dot_dimension_numbers<[1], [0], [0], [1], [0, 0, 1, 1], [], []>} : vector<16x32xbf16>, vector<32x128xbf16>, vector<16x128xf32> -> vector<16x128xf32>
    %190 = arith.addf %140, %189 : vector<16x128xf32>
    %191 = vector.extract_strided_slice %9 {offsets = [3, 0, 0], sizes = [1, 128, 32], strides = [1, 1, 1]} : vector<4x128x32xbf16> to vector<1x128x32xbf16>
    %192 = vector.shape_cast %191 : vector<1x128x32xbf16> to vector<128x32xbf16>
    %cst_86 = arith.constant dense<0.000000e+00> : vector<16x32xf32>
    %193 = tpu.matmul %4, %192, %cst_86 {dimension_numbers = #tpu.dot_dimension_numbers<[1], [0], [0], [1], [0, 0, 1, 1], [], []>} : vector<16x128xbf16>, vector<128x32xbf16>, vector<16x32xf32> -> vector<16x32xf32>
    %194 = vector.extract_strided_slice %11 {offsets = [3, 0, 0], sizes = [1, 1, 32], strides = [1, 1, 1]} : vector<4x1x32xf32> to vector<1x1x32xf32>
    %195 = vector.shape_cast %194 : vector<1x1x32xf32> to vector<1x32xf32>
    %196 = vector.broadcast %195 : vector<1x32xf32> to vector<16x32xf32>
    %197 = arith.addf %193, %196 : vector<16x32xf32>
    %198 = vector.extract_strided_slice %13 {offsets = [3, 0, 0], sizes = [1, 128, 32], strides = [1, 1, 1]} : vector<4x128x32xbf16> to vector<1x128x32xbf16>
    %199 = vector.shape_cast %198 : vector<1x128x32xbf16> to vector<128x32xbf16>
    %cst_87 = arith.constant dense<0.000000e+00> : vector<16x32xf32>
    %200 = tpu.matmul %4, %199, %cst_87 {dimension_numbers = #tpu.dot_dimension_numbers<[1], [0], [0], [1], [0, 0, 1, 1], [], []>} : vector<16x128xbf16>, vector<128x32xbf16>, vector<16x32xf32> -> vector<16x32xf32>
    %201 = vector.extract_strided_slice %15 {offsets = [3, 0, 0], sizes = [1, 1, 32], strides = [1, 1, 1]} : vector<4x1x32xf32> to vector<1x1x32xf32>
    %202 = vector.shape_cast %201 : vector<1x1x32xf32> to vector<1x32xf32>
    %203 = vector.broadcast %202 : vector<1x32xf32> to vector<16x32xf32>
    %204 = arith.addf %200, %203 : vector<16x32xf32>
    %205 = vector.extract_strided_slice %17 {offsets = [3, 0, 0], sizes = [1, 128, 32], strides = [1, 1, 1]} : vector<4x128x32xbf16> to vector<1x128x32xbf16>
    %206 = vector.shape_cast %205 : vector<1x128x32xbf16> to vector<128x32xbf16>
    %cst_88 = arith.constant dense<0.000000e+00> : vector<16x32xf32>
    %207 = tpu.matmul %4, %206, %cst_88 {dimension_numbers = #tpu.dot_dimension_numbers<[1], [0], [0], [1], [0, 0, 1, 1], [], []>} : vector<16x128xbf16>, vector<128x32xbf16>, vector<16x32xf32> -> vector<16x32xf32>
    %208 = vector.extract_strided_slice %19 {offsets = [3, 0, 0], sizes = [1, 1, 32], strides = [1, 1, 1]} : vector<4x1x32xf32> to vector<1x1x32xf32>
    %209 = vector.shape_cast %208 : vector<1x1x32xf32> to vector<1x32xf32>
    %210 = vector.broadcast %209 : vector<1x32xf32> to vector<16x32xf32>
    %211 = arith.addf %207, %210 : vector<16x32xf32>
    %212 = vector.shape_cast %197 : vector<16x32xf32> to vector<2x8x32xf32>
    %213 = arith.truncf %212 : vector<2x8x32xf32> to vector<2x8x32xbf16>
    %214 = vector.shape_cast %204 : vector<16x32xf32> to vector<2x8x32xf32>
    %215 = arith.truncf %214 : vector<2x8x32xf32> to vector<2x8x32xbf16>
    %216 = vector.shape_cast %211 : vector<16x32xf32> to vector<2x8x32xf32>
    %217 = arith.truncf %216 : vector<2x8x32xf32> to vector<2x8x32xbf16>
    "tpu.trace_start"() <{level = 10 : i32, message = "bqd,bkd->bqk"}> : () -> ()
    %cst_89 = arith.constant dense<0.000000e+00> : vector<2x8x8xf32>
    %218 = tpu.matmul %213, %215, %cst_89 {dimension_numbers = #tpu.dot_dimension_numbers<[2], [2], [1], [1], [0, 0, 0, 1, 1, 1], [0], [0]>} : vector<2x8x32xbf16>, vector<2x8x32xbf16>, vector<2x8x8xf32> -> vector<2x8x8xf32>
    "tpu.trace_stop"() : () -> ()
    %cst_90 = arith.constant 0.176776692 : f32
    %219 = vector.broadcast %cst_90 : f32 to vector<2x8x8xf32>
    %220 = arith.mulf %218, %219 : vector<2x8x8xf32>
    %221 = vector.broadcast %7 : vector<2x1x8xf32> to vector<2x8x8xf32>
    %222 = arith.addf %220, %221 : vector<2x8x8xf32>
    %cst_91 = arith.constant dense<0xFF800000> : vector<2x8xf32>
    %223 = vector.multi_reduction <maximumf>, %222, %cst_91 [2] : vector<2x8x8xf32> to vector<2x8xf32>
    %224 = vector.shape_cast %223 : vector<2x8xf32> to vector<2x8x1xf32>
    %225 = vector.broadcast %224 : vector<2x8x1xf32> to vector<2x8x8xf32>
    %226 = arith.subf %222, %225 : vector<2x8x8xf32>
    %227 = math.exp %226 : vector<2x8x8xf32>
    %cst_92 = arith.constant dense<0.000000e+00> : vector<2x8xf32>
    %228 = vector.multi_reduction <add>, %227, %cst_92 [2] : vector<2x8x8xf32> to vector<2x8xf32>
    %229 = vector.shape_cast %228 : vector<2x8xf32> to vector<2x8x1xf32>
    %230 = tpu.reciprocal %229 {approx = true} : vector<2x8x1xf32> -> vector<2x8x1xf32>
    %231 = vector.broadcast %230 : vector<2x8x1xf32> to vector<2x8x8xf32>
    %232 = arith.mulf %227, %231 : vector<2x8x8xf32>
    %233 = arith.truncf %232 : vector<2x8x8xf32> to vector<2x8x8xbf16>
    "tpu.trace_start"() <{level = 10 : i32, message = "bqk,bkd->bqd"}> : () -> ()
    %cst_93 = arith.constant dense<0.000000e+00> : vector<2x8x32xf32>
    %234 = tpu.matmul %233, %217, %cst_93 {dimension_numbers = #tpu.dot_dimension_numbers<[2], [1], [1], [2], [0, 0, 0, 1, 1, 2], [0], [0]>} : vector<2x8x8xbf16>, vector<2x8x32xbf16>, vector<2x8x32xf32> -> vector<2x8x32xf32>
    "tpu.trace_stop"() : () -> ()
    %235 = vector.shape_cast %234 : vector<2x8x32xf32> to vector<16x32xf32>
    %236 = arith.truncf %235 : vector<16x32xf32> to vector<16x32xbf16>
    %237 = vector.extract_strided_slice %21 {offsets = [3, 0, 0], sizes = [1, 32, 128], strides = [1, 1, 1]} : vector<4x32x128xbf16> to vector<1x32x128xbf16>
    %238 = vector.shape_cast %237 : vector<1x32x128xbf16> to vector<32x128xbf16>
    %cst_94 = arith.constant dense<0.000000e+00> : vector<16x128xf32>
    %239 = tpu.matmul %236, %238, %cst_94 {dimension_numbers = #tpu.dot_dimension_numbers<[1], [0], [0], [1], [0, 0, 1, 1], [], []>} : vector<16x32xbf16>, vector<32x128xbf16>, vector<16x128xf32> -> vector<16x128xf32>
    %240 = arith.addf %190, %239 : vector<16x128xf32>
    %241 = vector.broadcast %23 : vector<1x128xf32> to vector<16x128xf32>
    %242 = arith.addf %240, %241 : vector<16x128xf32>
    %243 = arith.addf %3, %242 : vector<16x128xf32>
    %cst_95 = arith.constant dense<0.000000e+00> : vector<16xf32>
    %244 = vector.multi_reduction <add>, %243, %cst_95 [1] : vector<16x128xf32> to vector<16xf32>
    %245 = vector.shape_cast %244 : vector<16xf32> to vector<16x1xf32>
    %cst_96 = arith.constant 1.280000e+02 : f32
    %246 = vector.broadcast %cst_96 : f32 to vector<16x1xf32>
    %247 = arith.divf %245, %246 : vector<16x1xf32>
    %248 = vector.broadcast %247 : vector<16x1xf32> to vector<16x128xf32>
    %249 = arith.subf %243, %248 : vector<16x128xf32>
    %250 = arith.mulf %249, %249 : vector<16x128xf32>
    %cst_97 = arith.constant dense<0.000000e+00> : vector<16xf32>
    %251 = vector.multi_reduction <add>, %250, %cst_97 [1] : vector<16x128xf32> to vector<16xf32>
    %252 = vector.shape_cast %251 : vector<16xf32> to vector<16x1xf32>
    %cst_98 = arith.constant 1.280000e+02 : f32
    %253 = vector.broadcast %cst_98 : f32 to vector<16x1xf32>
    %254 = arith.divf %252, %253 : vector<16x1xf32>
    %255 = vector.broadcast %247 : vector<16x1xf32> to vector<16x128xf32>
    %256 = arith.subf %243, %255 : vector<16x128xf32>
    %cst_99 = arith.constant 9.99999996E-13 : f32
    %257 = vector.broadcast %cst_99 : f32 to vector<16x1xf32>
    %258 = arith.addf %254, %257 : vector<16x1xf32>
    %259 = math.rsqrt %258 : vector<16x1xf32>
    %260 = vector.broadcast %259 : vector<16x1xf32> to vector<16x128xf32>
    %261 = arith.mulf %256, %260 : vector<16x128xf32>
    %262 = vector.broadcast %25 : vector<1x128xf32> to vector<16x128xf32>
    %263 = arith.mulf %261, %262 : vector<16x128xf32>
    %264 = vector.broadcast %27 : vector<1x128xf32> to vector<16x128xf32>
    %265 = arith.addf %263, %264 : vector<16x128xf32>
    %266 = arith.truncf %265 : vector<16x128xf32> to vector<16x128xbf16>
    %cst_100 = arith.constant dense<0.000000e+00> : vector<16x256xf32>
    %267 = tpu.matmul %266, %29, %cst_100 {dimension_numbers = #tpu.dot_dimension_numbers<[1], [0], [0], [1], [0, 0, 1, 1], [], []>} : vector<16x128xbf16>, vector<128x256xbf16>, vector<16x256xf32> -> vector<16x256xf32>
    %268 = vector.broadcast %31 : vector<1x256xf32> to vector<16x256xf32>
    %269 = arith.addf %267, %268 : vector<16x256xf32>
    %cst_101 = arith.constant 5.000000e-01 : f32
    %270 = vector.broadcast %cst_101 : f32 to vector<16x256xf32>
    %271 = arith.mulf %270, %269 : vector<16x256xf32>
    %cst_102 = arith.constant 4.471500e-02 : f32
    %272 = vector.broadcast %cst_102 : f32 to vector<16x256xf32>
    %273 = arith.mulf %272, %269 : vector<16x256xf32>
    %274 = arith.mulf %273, %269 : vector<16x256xf32>
    %275 = arith.mulf %274, %269 : vector<16x256xf32>
    %276 = arith.addf %269, %275 : vector<16x256xf32>
    %cst_103 = arith.constant 0.797884583 : f32
    %277 = vector.broadcast %cst_103 : f32 to vector<16x256xf32>
    %278 = arith.mulf %277, %276 : vector<16x256xf32>
    %279 = math.tanh %278 : vector<16x256xf32>
    %cst_104 = arith.constant 1.000000e+00 : f32
    %280 = vector.broadcast %cst_104 : f32 to vector<16x256xf32>
    %281 = arith.addf %280, %279 : vector<16x256xf32>
    %282 = arith.mulf %271, %281 : vector<16x256xf32>
    %283 = arith.truncf %282 : vector<16x256xf32> to vector<16x256xbf16>
    %cst_105 = arith.constant dense<0.000000e+00> : vector<16x128xf32>
    %284 = tpu.matmul %283, %33, %cst_105 {dimension_numbers = #tpu.dot_dimension_numbers<[1], [0], [0], [1], [0, 0, 1, 1], [], []>} : vector<16x256xbf16>, vector<256x128xbf16>, vector<16x128xf32> -> vector<16x128xf32>
    %285 = vector.broadcast %35 : vector<1x128xf32> to vector<16x128xf32>
    %286 = arith.addf %284, %285 : vector<16x128xf32>
    %287 = arith.addf %265, %286 : vector<16x128xf32>
    %cst_106 = arith.constant dense<0.000000e+00> : vector<16xf32>
    %288 = vector.multi_reduction <add>, %287, %cst_106 [1] : vector<16x128xf32> to vector<16xf32>
    %289 = vector.shape_cast %288 : vector<16xf32> to vector<16x1xf32>
    %cst_107 = arith.constant 1.280000e+02 : f32
    %290 = vector.broadcast %cst_107 : f32 to vector<16x1xf32>
    %291 = arith.divf %289, %290 : vector<16x1xf32>
    %292 = vector.broadcast %291 : vector<16x1xf32> to vector<16x128xf32>
    %293 = arith.subf %287, %292 : vector<16x128xf32>
    %294 = arith.mulf %293, %293 : vector<16x128xf32>
    %cst_108 = arith.constant dense<0.000000e+00> : vector<16xf32>
    %295 = vector.multi_reduction <add>, %294, %cst_108 [1] : vector<16x128xf32> to vector<16xf32>
    %296 = vector.shape_cast %295 : vector<16xf32> to vector<16x1xf32>
    %cst_109 = arith.constant 1.280000e+02 : f32
    %297 = vector.broadcast %cst_109 : f32 to vector<16x1xf32>
    %298 = arith.divf %296, %297 : vector<16x1xf32>
    %299 = vector.broadcast %291 : vector<16x1xf32> to vector<16x128xf32>
    %300 = arith.subf %287, %299 : vector<16x128xf32>
    %cst_110 = arith.constant 9.99999996E-13 : f32
    %301 = vector.broadcast %cst_110 : f32 to vector<16x1xf32>
    %302 = arith.addf %298, %301 : vector<16x1xf32>
    %303 = math.rsqrt %302 : vector<16x1xf32>
    %304 = vector.broadcast %303 : vector<16x1xf32> to vector<16x128xf32>
    %305 = arith.mulf %300, %304 : vector<16x128xf32>
    %306 = vector.broadcast %37 : vector<1x128xf32> to vector<16x128xf32>
    %307 = arith.mulf %305, %306 : vector<16x128xf32>
    %308 = vector.broadcast %39 : vector<1x128xf32> to vector<16x128xf32>
    %309 = arith.addf %307, %308 : vector<16x128xf32>
    %c0_111 = arith.constant 0 : index
    %c0_112 = arith.constant 0 : index
    %310 = vector.load %arg24[%c0_111, %c0_112] : memref<16x128xf32, #tpu.memory_space<vmem>>, vector<16x128xf32>
    tpu.vector_store %arg24[%c0_111, %c0_112], %309 {strides = array<i32>} : memref<16x128xf32, #tpu.memory_space<vmem>>, vector<16x128xf32>,
    %c1_i32 = arith.constant 1 : i32
    %311 = arith.cmpi eq, %arg0, %c1_i32 : i32
    %312 = arith.extui %311 : i1 to i32
    %c0_i32_113 = arith.constant 0 : i32
    %313 = arith.cmpi ne, %312, %c0_i32_113 : i32
    scf.if %313 {
      %314 = vector.extract_strided_slice %309 {offsets = [0, 0], sizes = [1, 128], strides = [1, 1]} : vector<16x128xf32> to vector<1x128xf32>
      %315 = vector.extract_strided_slice %309 {offsets = [8, 0], sizes = [1, 128], strides = [1, 1]} : vector<16x128xf32> to vector<1x128xf32>
      %316 = tpu.concatenate %314, %315 in 0 : vector<1x128xf32>, vector<1x128xf32> -> vector<2x128xf32>
      %317 = arith.truncf %316 : vector<2x128xf32> to vector<2x128xbf16>
      %c0_114 = arith.constant 0 : index
      %c0_115 = arith.constant 0 : index
      %318 = vector.load %arg21[%c0_114, %c0_115] : memref<128x128xbf16, #tpu.memory_space<vmem>>, vector<128x128xbf16>
      %cst_116 = arith.constant dense<0.000000e+00> : vector<2x128xf32>
      %319 = tpu.matmul %317, %318, %cst_116 {dimension_numbers = #tpu.dot_dimension_numbers<[1], [0], [0], [1], [0, 0, 1, 1], [], []>} : vector<2x128xbf16>, vector<128x128xbf16>, vector<2x128xf32> -> vector<2x128xf32>
      %c0_117 = arith.constant 0 : index
      %c0_118 = arith.constant 0 : index
      %320 = vector.load %arg22[%c0_117, %c0_118] : memref<1x128xf32, #tpu.memory_space<vmem>>, vector<1x128xf32>
      %321 = vector.broadcast %320 : vector<1x128xf32> to vector<2x128xf32>
      %322 = arith.addf %319, %321 : vector<2x128xf32>
      %c0_119 = arith.constant 0 : index
      %c0_120 = arith.constant 0 : index
      %323 = vector.load %arg23[%c0_119, %c0_120] : memref<2x128xf32, #tpu.memory_space<vmem>>, vector<2x128xf32>
      tpu.vector_store %arg23[%c0_119, %c0_120], %322 {strides = array<i32>} : memref<2x128xf32, #tpu.memory_space<vmem>>, vector<2x128xf32>,
    } else {
    }
    return
  }
  func.func @transform_0(%arg0: i32) -> (i32, i32) {
    %c0_i32 = arith.constant 0 : i32
    %c0_i32_0 = arith.constant 0 : i32
    %c0_i32_1 = arith.constant 0 : i32
    return %c0_i32, %c0_i32_0 : i32, i32
  }
  func.func @transform_1(%arg0: i32) -> (i32, i32) {
    %c0_i32 = arith.constant 0 : i32
    %c0_i32_0 = arith.constant 0 : i32
    %c0_i32_1 = arith.constant 0 : i32
    return %c0_i32, %c0_i32_0 : i32, i32
  }
  func.func @transform_2(%arg0: i32) -> (i32, i32) {
    %c0_i32 = arith.constant 0 : i32
    %c0_i32_0 = arith.constant 0 : i32
    %c0_i32_1 = arith.constant 0 : i32
    return %c0_i32, %c0_i32_0 : i32, i32
  }
  func.func @transform_3(%arg0: i32) -> (i32, i32) {
    %c0_i32 = arith.constant 0 : i32
    %c0_i32_0 = arith.constant 0 : i32
    %c0_i32_1 = arith.constant 0 : i32
    return %c0_i32, %c0_i32_0 : i32, i32
  }
  func.func @transform_4(%arg0: i32) -> (i32, i32, i32, i32) {
    %c0_i32 = arith.constant 0 : i32
    %c0_i32_0 = arith.constant 0 : i32
    %c0_i32_1 = arith.constant 0 : i32
    %c0_i32_2 = arith.constant 0 : i32
    return %arg0, %c0_i32, %c0_i32_0, %c0_i32_1 : i32, i32, i32, i32
  }
  func.func @transform_5(%arg0: i32) -> (i32, i32, i32, i32) {
    %c0_i32 = arith.constant 0 : i32
    %c0_i32_0 = arith.constant 0 : i32
    %c0_i32_1 = arith.constant 0 : i32
    %c0_i32_2 = arith.constant 0 : i32
    return %arg0, %c0_i32, %c0_i32_0, %c0_i32_1 : i32, i32, i32, i32
  }
  func.func @transform_6(%arg0: i32) -> (i32, i32, i32, i32) {
    %c0_i32 = arith.constant 0 : i32
    %c0_i32_0 = arith.constant 0 : i32
    %c0_i32_1 = arith.constant 0 : i32
    %c0_i32_2 = arith.constant 0 : i32
    return %arg0, %c0_i32, %c0_i32_0, %c0_i32_1 : i32, i32, i32, i32
  }
  func.func @transform_7(%arg0: i32) -> (i32, i32, i32, i32) {
    %c0_i32 = arith.constant 0 : i32
    %c0_i32_0 = arith.constant 0 : i32
    %c0_i32_1 = arith.constant 0 : i32
    %c0_i32_2 = arith.constant 0 : i32
    return %arg0, %c0_i32, %c0_i32_0, %c0_i32_1 : i32, i32, i32, i32
  }
  func.func @transform_8(%arg0: i32) -> (i32, i32, i32, i32) {
    %c0_i32 = arith.constant 0 : i32
    %c0_i32_0 = arith.constant 0 : i32
    %c0_i32_1 = arith.constant 0 : i32
    %c0_i32_2 = arith.constant 0 : i32
    return %arg0, %c0_i32, %c0_i32_0, %c0_i32_1 : i32, i32, i32, i32
  }
  func.func @transform_9(%arg0: i32) -> (i32, i32, i32, i32) {
    %c0_i32 = arith.constant 0 : i32
    %c0_i32_0 = arith.constant 0 : i32
    %c0_i32_1 = arith.constant 0 : i32
    %c0_i32_2 = arith.constant 0 : i32
    return %arg0, %c0_i32, %c0_i32_0, %c0_i32_1 : i32, i32, i32, i32
  }
  func.func @transform_10(%arg0: i32) -> (i32, i32, i32, i32) {
    %c0_i32 = arith.constant 0 : i32
    %c0_i32_0 = arith.constant 0 : i32
    %c0_i32_1 = arith.constant 0 : i32
    %c0_i32_2 = arith.constant 0 : i32
    return %arg0, %c0_i32, %c0_i32_0, %c0_i32_1 : i32, i32, i32, i32
  }
  func.func @transform_11(%arg0: i32) -> (i32, i32, i32) {
    %c0_i32 = arith.constant 0 : i32
    %c0_i32_0 = arith.constant 0 : i32
    %c0_i32_1 = arith.constant 0 : i32
    return %arg0, %c0_i32, %c0_i32_0 : i32, i32, i32
  }
  func.func @transform_12(%arg0: i32) -> (i32, i32, i32) {
    %c0_i32 = arith.constant 0 : i32
    %c0_i32_0 = arith.constant 0 : i32
    %c0_i32_1 = arith.constant 0 : i32
    return %arg0, %c0_i32, %c0_i32_0 : i32, i32, i32
  }
  func.func @transform_13(%arg0: i32) -> (i32, i32, i32) {
    %c0_i32 = arith.constant 0 : i32
    %c0_i32_0 = arith.constant 0 : i32
    %c0_i32_1 = arith.constant 0 : i32
    return %arg0, %c0_i32, %c0_i32_0 : i32, i32, i32
  }
  func.func @transform_14(%arg0: i32) -> (i32, i32, i32) {
    %c0_i32 = arith.constant 0 : i32
    %c0_i32_0 = arith.constant 0 : i32
    %c0_i32_1 = arith.constant 0 : i32
    return %arg0, %c0_i32, %c0_i32_0 : i32, i32, i32
  }
  func.func @transform_15(%arg0: i32) -> (i32, i32, i32) {
    %c0_i32 = arith.constant 0 : i32
    %c0_i32_0 = arith.constant 0 : i32
    %c0_i32_1 = arith.constant 0 : i32
    return %arg0, %c0_i32, %c0_i32_0 : i32, i32, i32
  }
  func.func @transform_16(%arg0: i32) -> (i32, i32, i32) {
    %c0_i32 = arith.constant 0 : i32
    %c0_i32_0 = arith.constant 0 : i32
    %c0_i32_1 = arith.constant 0 : i32
    return %arg0, %c0_i32, %c0_i32_0 : i32, i32, i32
  }
  func.func @transform_17(%arg0: i32) -> (i32, i32, i32) {
    %c0_i32 = arith.constant 0 : i32
    %c0_i32_0 = arith.constant 0 : i32
    %c0_i32_1 = arith.constant 0 : i32
    return %arg0, %c0_i32, %c0_i32_0 : i32, i32, i32
  }
  func.func @transform_18(%arg0: i32) -> (i32, i32, i32) {
    %c0_i32 = arith.constant 0 : i32
    %c0_i32_0 = arith.constant 0 : i32
    %c0_i32_1 = arith.constant 0 : i32
    return %arg0, %c0_i32, %c0_i32_0 : i32, i32, i32
  }
  func.func @transform_19(%arg0: i32) -> (i32, i32, i32) {
    %c0_i32 = arith.constant 0 : i32
    %c0_i32_0 = arith.constant 0 : i32
    %c0_i32_1 = arith.constant 0 : i32
    return %arg0, %c0_i32, %c0_i32_0 : i32, i32, i32
  }
  func.func @transform_20(%arg0: i32) -> (i32, i32) {
    %c0_i32 = arith.constant 0 : i32
    %c0_i32_0 = arith.constant 0 : i32
    %c0_i32_1 = arith.constant 0 : i32
    return %c0_i32, %c0_i32_0 : i32, i32
  }
  func.func @transform_21(%arg0: i32) -> (i32, i32) {
    %c0_i32 = arith.constant 0 : i32
    %c0_i32_0 = arith.constant 0 : i32
    %c0_i32_1 = arith.constant 0 : i32
    return %c0_i32, %c0_i32_0 : i32, i32
  }
  func.func @transform_22(%arg0: i32) -> (i32, i32) {
    %c0_i32 = arith.constant 0 : i32
    %c0_i32_0 = arith.constant 0 : i32
    %c0_i32_1 = arith.constant 0 : i32
    return %c0_i32, %c0_i32_0 : i32, i32
  }
}

</mosaic_0001>

<bundles_post_ra>
// kernel: tpu_custom_call.1
= control target key start
LH: loop header
LB: loop body
LE: loop exit
PB: predicated region body
PF: predicated region fallthrough
CT: control target
= control target key end

     0   :  { %s4810_s0 = inlined_call_operand.vmem [shape: f32[16,128], index: 0, kind: input, shape index: {}]   ;;  %s4811_s1 = inlined_call_operand.vmem [shape: f32[2,128], index: 1, kind: input, shape index: {}]   ;;  %s4812_s2 = inlined_call_operand.vmem [shape: f32[1,128], index: 2, kind: input, shape index: {}]   ;;  %s4813_s3 = inlined_call_operand.vmem [shape: f32[1,128], index: 3, kind: input, shape index: {}]   ;;  %s4814_s4 = inlined_call_operand.vmem [shape: bf16[2,4,128,32], index: 4, kind: input, shape index: {}]   ;;  %s4815_s5 = inlined_call_operand.vmem [shape: f32[2,4,1,32], index: 5, kind: input, shape index: {}]   ;;  %s4816_s6 = inlined_call_operand.vmem [shape: bf16[2,4,128,32], index: 6, kind: input, shape index: {}]   ;;  %s4817_s7 = inlined_call_operand.vmem [shape: f32[2,4,1,32], index: 7, kind: input, shape index: {}]   ;;  %s4818_s8 = inlined_call_operand.vmem [shape: bf16[2,4,128,32], index: 8, kind: input, shape index: {}]   ;;  %s4819_s9 = inlined_call_operand.vmem [shape: f32[2,4,1,32], index: 9, kind: input, shape index: {}]   ;;  %s4820_s10 = inlined_call_operand.vmem [shape: bf16[2,4,32,128], index: 10, kind: input, shape index: {}]   ;;  %s4821_s11 = inlined_call_operand.vmem [shape: f32[2,1,128], index: 11, kind: input, shape index: {}]   ;;  %s4822_s12 = inlined_call_operand.vmem [shape: f32[2,1,128], index: 12, kind: input, shape index: {}]   ;;  %s4823_s13 = inlined_call_operand.vmem [shape: f32[2,1,128], index: 13, kind: input, shape index: {}]   ;;  %s4824_s14 = inlined_call_operand.vmem [shape: bf16[2,128,256], index: 14, kind: input, shape index: {}]   ;;  %s4825_s15 = inlined_call_operand.vmem [shape: f32[2,1,256], index: 15, kind: input, shape index: {}]   ;;  %s4826_s16 = inlined_call_operand.vmem [shape: bf16[2,256,128], index: 16, kind: input, shape index: {}]   ;;  %s4827_s17 = inlined_call_operand.vmem [shape: f32[2,1,128], index: 17, kind: input, shape index: {}]   ;;  %s4828_s18 = inlined_call_operand.vmem [shape: f32[2,1,128], index: 18, kind: input, shape index: {}]   ;;  %s4829_s19 = inlined_call_operand.vmem [shape: f32[2,1,128], index: 19, kind: input, shape index: {}]   ;;  %s4830_s20 = inlined_call_operand.vmem [shape: bf16[128,128], index: 20, kind: input, shape index: {}]   ;;  %s4831_s21 = inlined_call_operand.vmem [shape: f32[1,128], index: 21, kind: input, shape index: {}]   ;;  %s4832_s22 = inlined_call_operand.hbm [shape: f32[2,128], index: 22, kind: output, shape index: {}]  }
   0x1   :  { %4840 = sst [smem:[#allocation11_spill]] %s4810_s0 }
   0x2   :  { %4841 = sst [smem:[#allocation12_spill]] %s4811_s1 }
   0x3   :  { %4842 = sst [smem:[#allocation13_spill]] %s4812_s2 }
   0x4   :  { %4843 = sst [smem:[#allocation14_spill]] %s4813_s3 }
   0x5   :  { %4844 = sst [smem:[#allocation15_spill]] %s4814_s4 }
   0x6   :  { %4845 = sst [smem:[#allocation16_spill]] %s4815_s5 }
   0x7   :  { %4846 = sst [smem:[#allocation17_spill]] %s4816_s6 }
   0x8   :  { %4847 = sst [smem:[#allocation18_spill]] %s4817_s7 }
   0x9   :  { %4848 = sst [smem:[#allocation19_spill]] %s4818_s8 }
   0xa   :  { %4849 = sst [smem:[#allocation20_spill]] %s4819_s9 }
   0xb   :  { %4850 = sst [smem:[#allocation21_spill]] %s4820_s10 }
   0xc   :  { %4851 = sst [smem:[#allocation22_spill]] %s4824_s14 }
   0xd   :  { %4852 = sst [smem:[#allocation23_spill]] %s4830_s20 }
   0xe   :  { %4853 = sst [smem:[#allocation24_spill]] %s4831_s21 }
   0xf   :  { %4854 = sst [smem:[#allocation25_spill]] %s4832_s22 }
  0x10   :  { %27 = vsyncpa [#allocation4], 0  ;;  %s4347_s3 = smov 0  }
  0x11 LB: > { %4855 = sst [smem:[#allocation6_spill]] %s4227_s3  ;;  %s4353_s28 = sadd.s32 4294967295, %s4227_s3   ;;  %s4227_s3 = sphi %s4347_s3, %s33_s3  }
  0x12   : > { %4856 = sst [smem:[#allocation7_spill]] %s4353_s28  ;;  %p3324_p0 = scmp.ge.s32.totalorder %s4227_s3, 1 }
  0x13   : > { %p742_p1 = scmp.lt.s32.totalorder %s4227_s3, 3 }
  0x15   : > { %p743_p2 = pnand %p3324_p0, %p742_p1 }
  0x17   : > { %746 = sbr.rel (%p743_p2) target bundleno = 3746 (0xea2), region = 108 }
  0x1c   : > { %p858_p3 = scmp.lt.s32.totalorder %s4353_s28, 1  ;;  %s4857_s1 = sld [smem:[#allocation15_spill]] }
  0x1d   : > { %s4858_s25 = sld [smem:[#allocation16_spill]] }
  0x1e   : > { %s4359_s29 = scalar_select %p858_p3, %s4353_s28, 1 }
  0x1f   : > { %s4860_s3 = sld [smem:[#allocation17_spill]] }
  0x20   : > { %s3943_s30 = sshll.u32 %s4359_s29, 8  ;;  %s3327_s4 = sshll.u32 %s4359_s29, 2 }
  0x21   : > { %s4862_s7 = sld [smem:[#allocation18_spill]]  ;;  %s3946_s2 = sshll.u32 %s4359_s29, 6 }
  0x22   : > { %s4366_s5 = scalar_lea.vmem %s4857_s1, %s3943_s30  ;;  %s4864_s8 = sld [smem:[#allocation19_spill]] }
  0x23   : > { %s4371_s26 = scalar_lea.vmem %s4858_s25, %s3327_s4  ;;  %s4865_s9 = sld [smem:[#allocation20_spill]] }
  0x24   : > { %4859 = sst [smem:[#allocation8_spill]] %s4371_s26  ;;  %s3338_s27 = sshll.u32 %s4359_s29, 1 }
  0x25   : > { %s4376_s22 = scalar_lea.vmem %s4860_s3, %s3943_s30  ;;  %s4866_s10 = sld [smem:[#allocation21_spill]] }
  0x26   : > { %4861 = sst [smem:[#allocation9_spill]] %s4376_s22  ;;  %s4421_s22 = scalar_lea.vmem %s4825_s15, %s3338_s27 }
  0x27   : > { %s4381_s28 = scalar_lea.vmem %s4862_s7, %s3327_s4  ;;  %s4867_s14 = sld [smem:[#allocation22_spill]] }
  0x28   : > { %4863 = sst [smem:[#allocation10_spill]] %s4381_s28  ;;  %s4386_s1 = scalar_lea.vmem %s4864_s8, %s3943_s30 }
  0x29   : > { %s4391_s25 = scalar_lea.vmem %s4865_s9, %s3327_s4  ;;  %s3947_s4 = sshll.u32 %s4359_s29, 7 }
  0x2a   : > { %s4426_s7 = scalar_lea.vmem %s4826_s16, %s3947_s4  ;;  %s915_s23 = scalar_lea.vmem %s4827_s17, %s4359_s29 }
  0x2b   : > { %s4401_s21 = scalar_lea.vmem %s4866_s10, %s3946_s2  ;;  %s918_s8 = scalar_lea.vmem %s4828_s18, %s4359_s29 }
  0x2c   : > { %s4868_s26 = sld [smem:[#allocation7_spill]] }
  0x2d   : > { %s4415_s9 = scalar_lea.vmem %s4867_s14, %s3947_s4  ;;  %s921_s14 = scalar_lea.vmem %s4829_s19, %s4359_s29 }
  0x32   : > { %p3341_p4 = scmp.ne.s32.totalorder %s4868_s26, 0 }
  0x33   : > { %s4869_s2 = sld [smem:[#allocation11_spill]] (!%p3341_p4) }
  0x34   : > { %926 = sbr.rel (%p3341_p4) target bundleno = 333 (0x14d), region = 112  ;;  %s4870_s24 = sld [smem:[#allocation13_spill]] (!%p3341_p4) }
  0x35   : > { %s4871_s6 = sld [smem:[#allocation14_spill]] (!%p3341_p4) }
  0x39   : > { %v927_v0 = vld [vmem:[%s4869_s2] sm:$0xff]  ;;  %v928_v1 = vld [vmem:[%s4869_s2 + $0x8] sm:$0xff]  ;;  %v4229_v2 = vmov 128.0  }
  0x3a   : > { %931 = vadd.xlane.f32.xlu0 %v927_v0  ;;  %4112 = vrcp.f32 %v4229_v2  ;;  %v4110_v31 = vld [vmem:[%s4870_s24] ss:$0 sm:$0xff] }
  0x3b   : > { %v4111_v34 = vld [vmem:[%s4871_s6] ss:$0 sm:$0xff] }
  0x40   : > { %v4113_v3 = vpop.eup %4112 }
  0x41   : > { %v936_v4 = vmul.f32 128.0, %v4113_v3  ;;  %vm940_vm0 = vweird.f32 %v4113_v3 }
  0x42   : > { %933 = vadd.xlane.f32.xlu0 %v928_v1 }
  0x43   : > { %v937_v5 = vsub.f32 1.0, %v936_v4 }
  0x45   : > { %v938_v6 = vmul.f32 %v4113_v3, %v937_v5 }
  0x47   : > { %v939_v7 = vadd.f32 %v4113_v3, %v938_v6 }
  0x49   : > { %v941_v8 = vsel %vm940_vm0, %v4113_v3, %v939_v7 }
  0xad   : > { %v932_v9 = vpop.xlane.xlu0 %931 }
  0xae   : > { %v942_v10 = vmul.f32 %v941_v8, %v932_v9 }
  0xb0   : > { %v944_v11 = vsub.f32 %v927_v0, %v942_v10 }
  0xb2   : > { %v946_v12 = vmul.f32 %v944_v11, %v944_v11 }
  0xb4   : > { %948 = vadd.xlane.f32.xlu1 %v946_v12 }
  0xb5   : > { %v934_v13 = vpop.xlane.xlu0 %933 }
  0xb6   : > { %v943_v14 = vmul.f32 %v941_v8, %v934_v13 }
  0xb8   : > { %v945_v15 = vsub.f32 %v928_v1, %v943_v14 }
  0xba   : > { %v947_v16 = vmul.f32 %v945_v15, %v945_v15 }
  0xbc   : > { %950 = vadd.xlane.f32.xlu1 %v947_v16 }
 0x127   : > { %v949_v17 = vpop.xlane.xlu1 %948 }
 0x128   : > { %v952_v18 = vmul.f32 %v949_v17, %v941_v8 }
 0x12a   : > { %v954_v19 = vadd.f32 1e-12, %v952_v18 }
 0x12c   : > { %4114 = vrsqrt.f32 %v954_v19  ;;  %vm962_vm2 = vweird.f32 %v954_v19 }
 0x12f   : > { %v951_v20 = vpop.xlane.xlu1 %950 }
 0x130   : > { %v953_v21 = vmul.f32 %v951_v20, %v941_v8 }
 0x132   : > { %v4115_v22 = vpop.eup %4114  ;;  %v955_v23 = vadd.f32 1e-12, %v953_v21 }
 0x133   : > { %v957_v24 = vmul.f32 %v4115_v22, %v954_v19  ;;  %vm963_vm1 = vweird.f32 %v4115_v22 }
 0x134   : > { %4116 = vrsqrt.f32 %v955_v23  ;;  %vm964_vm3 = vmor %vm962_vm2, %vm963_vm1  ;;  %vm972_vm5 = vweird.f32 %v955_v23 }
 0x135   : > { %v958_v25 = vmul.f32 %v4115_v22, %v957_v24 }
 0x137   : > { %v959_v26 = vmul.f32 0.5, %v958_v25 }
 0x139   : > { %v960_v27 = vsub.f32 1.5, %v959_v26 }
 0x13a   : > { %v4117_v28 = vpop.eup %4116 }
 0x13b   : > { %v961_v29 = vmul.f32 %v4115_v22, %v960_v27  ;;  %v967_v30 = vmul.f32 %v4117_v28, %v955_v23  ;;  %vm973_vm4 = vweird.f32 %v4117_v28 }
 0x13c   : > { %vm974_vm6 = vmor %vm972_vm5, %vm973_vm4 }
 0x13d   : > { %v965_v32 = vsel %vm964_vm3, %v4115_v22, %v961_v29  ;;  %v968_v33 = vmul.f32 %v4117_v28, %v967_v30 }
 0x13e   : > { %v976_v35 = vmul.f32 %v965_v32, %v944_v11 }
 0x13f   : > { %v969_v36 = vmul.f32 0.5, %v968_v33 }
 0x140   : > { %v981_v37 = vmul.f32 %v4110_v31, %v976_v35 }
 0x141   : > { %v970_v38 = vsub.f32 1.5, %v969_v36 }
 0x142   : > { %v986_v39 = vadd.f32 %v4111_v34, %v981_v37 }
 0x143   : > { %v971_v40 = vmul.f32 %v4117_v28, %v970_v38 }
 0x144   : > { %988 = vst [vmem:[#allocation2] sm:$0xff] %v986_v39 }
 0x145   : > { %v975_v41 = vsel %vm974_vm6, %v4117_v28, %v971_v40 }
 0x146   : > { %v977_v42 = vmul.f32 %v975_v41, %v945_v15 }
 0x148   : > { %v982_v43 = vmul.f32 %v4110_v31, %v977_v42 }
 0x14a   : > { %v987_v44 = vadd.f32 %v4111_v34, %v982_v43 }
 0x14c   : > { %989 = vst [vmem:[#allocation2 + $0x8] sm:$0xff] %v987_v44 }
 0x14d PF: > { %s4872_s26 = sld [smem:[#allocation9_spill]]  ;;  %v3956_v45 = vld [vmem:[%s4366_s5 + $0x38] sm:$0xff]  ;;  %v3955_v47 = vld [vmem:[%s4366_s5 + $0x30] sm:$0xff]  ;;  %v3954_v49 = vld [vmem:[%s4366_s5 + $0x28] sm:$0xff]  ;;  %vm1472_vm7 = vcmask 261120   ;;  %vm1519_vm8 = vcmask 64512   ;;  %s4877_s30 = scalar_lea.vmem %s4822_s12, %s4359_s29 }
 0x14e   : > { %1322 = vmatpush.bf16.msra.mxu0 %v3956_v45  ;;  %v3953_v51 = vld [vmem:[%s4366_s5 + $0x20] sm:$0xff]  ;;  %v3952_v53 = vld [vmem:[%s4366_s5 + $0x18] sm:$0xff]  ;;  %v3951_v55 = vld [vmem:[%s4366_s5 + $0x10] sm:$0xff]  ;;  %s4873_s27 = sld [smem:[#allocation10_spill]]  ;;  %vm1547_vm9 = vcmask 1043456   ;;  %s4878_s0 = scalar_lea.vmem %s4823_s13, %s4359_s29 }
 0x14f   : > { %s4874_s3 = sld [smem:[#allocation8_spill]]  ;;  %v3950_v57 = vld [vmem:[%s4366_s5 + $0x8] sm:$0xff]  ;;  %v3949_v59 = vld [vmem:[%s4366_s5] sm:$0xff]  ;;  %v4020_v16 = vld [vmem:[%s4386_s1 + $0x38] sm:$0xff] }
 0x150   : > { %v990_v61 = vld [vmem:[#allocation2] sm:$0xff]  ;;  %1452 = vmatpush.bf16.msra.mxu2 %v4020_v16  ;;  %v4019_v17 = vld [vmem:[%s4386_s1 + $0x30] sm:$0xff]  ;;  %s4875_s10 = sld [smem:[#allocation12_spill]]  ;;  %v4018_v19 = vld [vmem:[%s4386_s1 + $0x28] sm:$0xff] }
 0x151   : > { %v4017_v23 = vld [vmem:[%s4386_s1 + $0x20] sm:$0xff]  ;;  %v4016_v26 = vld [vmem:[%s4386_s1 + $0x18] sm:$0xff]  ;;  %v4015_v28 = vld [vmem:[%s4386_s1 + $0x10] sm:$0xff] }
 0x152   : > { %1323 = vmatpush.bf16.msra.mxu0 %v3955_v47  ;;  %v4014_v30 = vld [vmem:[%s4386_s1 + $0x8] sm:$0xff]  ;;  %v4013_v34 = vld [vmem:[%s4386_s1] sm:$0xff]  ;;  %v3964_v42 = vld [vmem:[%s4366_s5 + $0x78] sm:$0xff] }
 0x153   : > { %v3988_v46 = vld [vmem:[%s4872_s26 + $0x38] sm:$0xff]  ;;  %v3987_v48 = vld [vmem:[%s4872_s26 + $0x30] sm:$0xff]  ;;  %v3986_v50 = vld [vmem:[%s4872_s26 + $0x28] sm:$0xff] }
 0x154   : > { %1387 = vmatpush.bf16.msra.mxu1 %v3988_v46  ;;  %v3985_v52 = vld [vmem:[%s4872_s26 + $0x20] sm:$0xff]  ;;  %v3984_v54 = vld [vmem:[%s4872_s26 + $0x18] sm:$0xff]  ;;  %v3983_v56 = vld [vmem:[%s4872_s26 + $0x10] sm:$0xff]  ;;  %1453 = vmatpush.bf16.msra.mxu2 %v4019_v17 }
 0x155   : > { %v3982_v58 = vld [vmem:[%s4872_s26 + $0x8] sm:$0xff]  ;;  %v3981_v60 = vld [vmem:[%s4872_s26] sm:$0xff]  ;;  %v3996_v36 = vld [vmem:[%s4872_s26 + $0x78] sm:$0xff] }
 0x156   : > { %1324 = vmatpush.bf16.msra.mxu0 %v3954_v49  ;;  %v991_v62 = vld [vmem:[#allocation2 + $0x8] sm:$0xff]  ;;  %v4119_v0 = vld [vmem:[%s4873_s27] ss:$0 sm:$0xff]  ;;  %v3995_v38 = vld [vmem:[%s4872_s26 + $0x70] sm:$0xff] }
 0x157   : > { %v4469_v63 = vpack.c.bf16 %v991_v62, %v990_v61  ;;  %v4118_v2 = vld [vmem:[%s4874_s3] ss:$0 sm:$0xff]  ;;  %v3994_v40 = vld [vmem:[%s4872_s26 + $0x68] sm:$0xff]  ;;  %v3992_v43 = vld [vmem:[%s4872_s26 + $0x58] sm:$0xff] }
 0x158   : > { %1388 = vmatpush.bf16.msra.mxu1 %v3987_v48  ;;  %v993_v18 = vld [vmem:[%s4875_s10] sm:$0x3]  ;;  %1454 = vmatpush.bf16.msra.mxu2 %v4018_v19  ;;  %v3963_v44 = vld [vmem:[%s4366_s5 + $0x70] sm:$0xff]  ;;  %v3962_v46 = vld [vmem:[%s4366_s5 + $0x68] sm:$0xff] }
 0x159   : > { %v4485_v20 = vperm.slane %v993_v18, 0  ;;  %v995_v29 = vrot.slane %v993_v18, 1  ;;  %v3993_v41 = vld [vmem:[%s4872_s26 + $0x60] sm:$0xff]  ;;  %v3991_v45 = vld [vmem:[%s4872_s26 + $0x50] sm:$0xff]  ;;  %v3990_v47 = vld [vmem:[%s4872_s26 + $0x48] sm:$0xff] }
 0x15a   : > { %1325 = vmatpush.bf16.msra.mxu0 %v3953_v51  ;;  %v3961_v48 = vld [vmem:[%s4366_s5 + $0x60] sm:$0xff]  ;;  %v3959_v51 = vld [vmem:[%s4366_s5 + $0x50] sm:$0xff] }
 0x15b   : > { %v4493_v31 = vperm.slane %v995_v29, 0  ;;  %v3989_v49 = vld [vmem:[%s4872_s26 + $0x40] sm:$0xff] }
 0x15c   : > { %1389 = vmatpush.bf16.msra.mxu1 %v3986_v50  ;;  %1455 = vmatpush.bf16.msra.mxu2 %v4017_v23  ;;  %v3960_v50 = vld [vmem:[%s4366_s5 + $0x58] sm:$0xff] }
 0x15e   : > { %1326 = vmatpush.bf16.msra.mxu0 %v3952_v53  ;;  %v3957_v53 = vld [vmem:[%s4366_s5 + $0x40] sm:$0xff] }
 0x160   : > { %1390 = vmatpush.bf16.msra.mxu1 %v3985_v52  ;;  %1456 = vmatpush.bf16.msra.mxu2 %v4016_v26  ;;  %v3958_v52 = vld [vmem:[%s4366_s5 + $0x48] sm:$0xff] }
 0x162   : > { %1327 = vmatpush.bf16.msra.mxu0 %v3951_v55 }
 0x164   : > { %1391 = vmatpush.bf16.msra.mxu1 %v3984_v54  ;;  %1457 = vmatpush.bf16.msra.mxu2 %v4015_v28  ;;  %v4122_v28 = vld [vmem:[%s4874_s3 + $0x1] ss:$0 sm:$0xff] }
 0x166   : > { %1328 = vmatpush.bf16.msra.mxu0 %v3950_v57 }
 0x168   : > { %1392 = vmatpush.bf16.msra.mxu1 %v3983_v56  ;;  %1458 = vmatpush.bf16.msra.mxu2 %v4014_v30 }
 0x16a   : > { %1329 = vmatpush.bf16.msra.mxu0 %v3949_v59 }
 0x16c   : > { %1393 = vmatpush.bf16.msra.mxu1 %v3982_v58  ;;  %1459 = vmatpush.bf16.msra.mxu2 %v4013_v34 }
 0x16d   : > { %1330 = vmatmul.bf16.vlgmr.msra.gmra.mxu0 %v4469_v63 }
 0x16f   : > { %1460 = vmatmul.bf16.vlgmr.msra.gmra.mxu2 %v4469_v63 }
 0x170   : > { %1394 = vmatpush.bf16.msra.mxu1 %v3981_v60  ;;  %1700 = vmatpush.bf16.msrb.mxu2 %v3996_v36  ;;  %v4046_v36 = vld [vmem:[%s4401_s21 + $0x8] sm:$0xff] }
 0x173   : > { %1395 = vmatmul.bf16.vlgmr.msra.gmra.mxu1 %v4469_v63 }
 0x174   : > { %1701 = vmatpush.bf16.msrb.mxu2 %v3995_v38  ;;  %1635 = vmatpush.bf16.msrb.mxu1 %v3964_v42 }
 0x178   : > { %1702 = vmatpush.bf16.msrb.mxu2 %v3994_v40  ;;  %1636 = vmatpush.bf16.msrb.mxu1 %v3963_v44 }
 0x17c   : > { %1703 = vmatpush.bf16.msrb.mxu2 %v3993_v41  ;;  %1637 = vmatpush.bf16.msrb.mxu1 %v3962_v46  ;;  %v4026_v46 = vld [vmem:[%s4386_s1 + $0x68] sm:$0xff] }
 0x180   : > { %1704 = vmatpush.bf16.msrb.mxu2 %v3992_v43  ;;  %1638 = vmatpush.bf16.msrb.mxu1 %v3961_v48  ;;  %v4028_v43 = vld [vmem:[%s4386_s1 + $0x78] sm:$0xff]  ;;  %v4025_v48 = vld [vmem:[%s4386_s1 + $0x60] sm:$0xff] }
 0x184   : > { %1705 = vmatpush.bf16.msrb.mxu2 %v3991_v45  ;;  %1639 = vmatpush.bf16.msrb.mxu1 %v3960_v50  ;;  %v4027_v45 = vld [vmem:[%s4386_s1 + $0x70] sm:$0xff] }
 0x188   : > { %1706 = vmatpush.bf16.msrb.mxu2 %v3990_v47  ;;  %1640 = vmatpush.bf16.msrb.mxu1 %v3959_v51  ;;  %v4023_v51 = vld [vmem:[%s4386_s1 + $0x50] sm:$0xff] }
 0x18c   : > { %1707 = vmatpush.bf16.msrb.mxu2 %v3989_v49  ;;  %1641 = vmatpush.bf16.msrb.mxu1 %v3958_v52  ;;  %v4024_v49 = vld [vmem:[%s4386_s1 + $0x58] sm:$0xff] }
 0x18f   : > { %1708 = vmatmul.bf16.vlgmr.msrb.gmra.mxu2 %v4469_v63 }
 0x190   : > { %1642 = vmatpush.bf16.msrb.mxu1 %v3957_v53 }
 0x193   : > { %1643 = vmatmul.bf16.vlgmr.msrb.gmra.mxu1 %v4469_v63 }
 0x1ea   : > { %v1331_v5 = vpop.f32.mrf.mxu0 }
 0x1eb   : > { %v1332_v6 = vadd.f32 %v4118_v2, %v1331_v5 }
 0x1ed   : > { %v1466_v9 = vpack.c.bf16 %v1332_v6, %v1332_v6 }
 0x1f0   : > { %v1396_v1 = vpop.f32.mrf.mxu1 }
 0x1f1   : > { %v1397_v3 = vadd.f32 %v4119_v0, %v1396_v1  ;;  %v4120_v1 = vld [vmem:[%s4391_s25] ss:$0 sm:$0xff] }
 0x1f2   : > { %v1333_v13 = vpop.f32.mrf.mxu0 }
 0x1f3   : > { %v1468_v4 = vpack.c.bf16 %v1397_v3, %v1397_v3  ;;  %v1334_v14 = vadd.f32 %v4118_v2, %v1333_v13  ;;  %v1461_v2 = vpop.f32.mrf.mxu2 }
 0x1f4   : > { %v1462_v3 = vadd.f32 %v4120_v1, %v1461_v2 }
 0x1f5   : > { %v1477_v7 = vsel %vm1472_vm7, %v1468_v4, 0  ;;  %v1467_v15 = vpack.c.bf16 %v1334_v14, %v1334_v14 }
 0x1f6   : > { %1486 = vmatpush.bf16.xpose.msra.mxu3 %v1477_v7  ;;  %v1470_v4 = vpack.c.bf16 %v1462_v3, %v1462_v3 }
 0x1f8   : > { %v1398_v8 = vpop.f32.mrf.mxu1  ;;  %v1549_v5 = vsel %vm1547_vm9, %v1470_v4, 0 }
 0x1f9   : > { %v1399_v10 = vadd.f32 %v4119_v0, %v1398_v8 }
 0x1fb   : > { %v1469_v11 = vpack.c.bf16 %v1399_v10, %v1399_v10  ;;  %v1463_v6 = vpop.f32.mrf.mxu2  ;;  %v4121_v10 = vld [vmem:[%s4873_s27 + $0x1] ss:$0 sm:$0xff] }
 0x1fc   : > { %v1464_v7 = vadd.f32 %v4120_v1, %v1463_v6 }
 0x1fd   : > { %3438 = vmatmul.msk.bf16.vlgmr.msra.gmra.mxu3 %vm1472_vm7, %v1466_v9  ;;  %v1496_v12 = vsel %vm1472_vm7, %v1469_v11, 0 }
 0x1fe   : > { %1505 = vmatpush.bf16.xpose.msrb.mxu3 %v1496_v12  ;;  %v1471_v8 = vpack.c.bf16 %v1464_v7, %v1464_v7 }
 0x200   : > { %v1568_v9 = vsel %vm1547_vm9, %v1471_v8, 0  ;;  %v4123_v8 = vld [vmem:[%s4391_s25 + $0x1] ss:$0 sm:$0xff] }
 0x201   : > { %1577 = vmatpush.bf16.msrb.mxu0 %v1568_v9 }
 0x206   : > { %1558 = vmatpush.bf16.msra.mxu3 %v1549_v5 }
 0x20d   : > { %3439 = vmatmul.msk.bf16.vlgmr.msrb.gmra.mxu3 %vm1472_vm7, %v1467_v15 }
 0x20e   : > { %1765 = vmatpush.bf16.msrb.mxu3 %v4028_v43 }
 0x210   : > { %v1644_v29 = vpop.f32.mrf.mxu1 }
 0x211   : > { %v1645_v30 = vadd.f32 %v4122_v28, %v1644_v29  ;;  %v3968_v29 = vld [vmem:[%s4366_s5 + $0x98] sm:$0xff] }
 0x212   : > { %v1709_v11 = vpop.f32.mrf.mxu2  ;;  %1766 = vmatpush.bf16.msrb.mxu3 %v4027_v45 }
 0x213   : > { %v1710_v12 = vadd.f32 %v4121_v10, %v1709_v11 }
 0x215   : > { %v1781_v13 = vpack.c.bf16 %v1710_v12, %v1710_v12 }
 0x216   : > { %1767 = vmatpush.bf16.msrb.mxu3 %v4026_v46 }
 0x217   : > { %v1789_v14 = vsel %vm1472_vm7, %v1781_v13, 0 }
 0x218   : > { %1798 = vmatpush.bf16.xpose.msra.mxu0 %v1789_v14 }
 0x21a   : > { %v1711_v19 = vpop.f32.mrf.mxu2  ;;  %1768 = vmatpush.bf16.msrb.mxu3 %v4025_v48 }
 0x21e   : > { %1769 = vmatpush.bf16.msrb.mxu3 %v4024_v49 }
 0x222   : > { %1770 = vmatpush.bf16.msrb.mxu3 %v4023_v51 }
 0x280   : > { %v1488_v21 = vpop.f32.mrf.mxu3 }
 0x281   : > { %v1511_v22 = vmul.f32 0.17677669, %v1488_v21 }
 0x283   : > { %v1517_v24 = vadd.f32 %v4485_v20, %v1511_v22  ;;  %v1712_v22 = vadd.f32 %v4121_v10, %v1711_v19  ;;  %v4002_v19 = vld [vmem:[%s4872_s26 + $0xa8] sm:$0xff] }
 0x285   : > { %v1520_v25 = vsel %vm1519_vm8, %v1517_v24, -inf  ;;  %v1782_v23 = vpack.c.bf16 %v1712_v22, %v1712_v22  ;;  %v4001_v22 = vld [vmem:[%s4872_s26 + $0xa0] sm:$0xff] }
 0x286   : > { %1521 = vmax.xlane.f32.xlu1 %v1520_v25 }
 0x288   : > { %v1490_v27 = vpop.f32.mrf.mxu3 }
 0x289   : > { %v1808_v27 = vsel %vm1472_vm7, %v1782_v23, 0  ;;  %v3971_v23 = vld [vmem:[%s4366_s5 + $0xb0] sm:$0xff] }
 0x290   : > { %v1507_v32 = vpop.f32.mrf.mxu3 }
 0x291   : > { %v1512_v33 = vmul.f32 0.17677669, %v1507_v32  ;;  %v1779_v32 = vpack.c.bf16 %v1645_v30, %v1645_v30  ;;  %v3997_v30 = vld [vmem:[%s4872_s26 + $0x80] sm:$0xff] }
 0x293   : > { %v1518_v35 = vadd.f32 %v4493_v31, %v1512_v33  ;;  %v1646_v33 = vpop.f32.mrf.mxu1 }
 0x294   : > { %v1647_v34 = vadd.f32 %v4122_v28, %v1646_v33  ;;  %v3998_v28 = vld [vmem:[%s4872_s26 + $0x88] sm:$0xff] }
 0x295   : > { %v1523_v37 = vsel %vm1519_vm8, %v1518_v35, -inf  ;;  %v3966_v33 = vld [vmem:[%s4366_s5 + $0x88] sm:$0xff] }
 0x296   : > { %1524 = vmax.xlane.f32.xlu0 %v1523_v37  ;;  %v4045_v37 = vld [vmem:[%s4401_s21] sm:$0xff] }
 0x298   : > { %v1509_v39 = vpop.f32.mrf.mxu3 }
 0x2f9   : > { %v1522_v54 = vpop.xlane.xlu1 %1521 }
 0x2fa   : > { %v1526_v55 = vsub.f32 %v1517_v24, %v1522_v54  ;;  %v4022_v54 = vld [vmem:[%s4386_s1 + $0x48] sm:$0xff] }
 0x2fb   : > { %1771 = vmatpush.bf16.msrb.mxu3 %v4022_v54 }
 0x2fc   : > { %v1528_v56 = vmul.f32 1.442695, %v1526_v55 }
 0x2fe   : > { %4136 = vpow2.f32 %v1528_v56 }
 0x304   : > { %v4137_v57 = vpop.eup %4136 }
 0x305   : > { %v1532_v58 = vsel %vm1519_vm8, %v4137_v57, 0.0 }
 0x306   : > { %1533 = vadd.xlane.f32.xlu1 %v1532_v58  ;;  %v4021_v58 = vld [vmem:[%s4386_s1 + $0x40] sm:$0xff] }
 0x307   : > { %1772 = vmatpush.bf16.msrb.mxu3 %v4021_v58 }
 0x309   : > { %v1525_v59 = vpop.xlane.xlu0 %1524 }
 0x30a   : > { %v1527_v60 = vsub.f32 %v1518_v35, %v1525_v59  ;;  %v1780_v35 = vpack.c.bf16 %v1647_v34, %v1647_v34  ;;  %v3965_v34 = vld [vmem:[%s4366_s5 + $0x80] sm:$0xff] }
 0x30c   : > { %v1530_v61 = vmul.f32 1.442695, %v1527_v60 }
 0x30e   : > { %4138 = vpow2.f32 %v1530_v61 }
 0x314   : > { %v4139_v62 = vpop.eup %4138 }
 0x315   : > { %v1535_v0 = vsel %vm1519_vm8, %v4139_v62, 0.0 }
 0x316   : > { %1536 = vadd.xlane.f32.xlu0 %v1535_v0 }
 0x379   : > { %v1534_v15 = vpop.xlane.xlu1 %1533 }
 0x37a   : > { %4140 = vrcp.f32 %v1534_v15 }
 0x380   : > { %v4141_v16 = vpop.eup %4140 }
 0x381   : > { %v1540_v17 = vmul.f32 %v4141_v16, %v4137_v57  ;;  %v4004_v16 = vld [vmem:[%s4872_s26 + $0xb8] sm:$0xff] }
 0x383   : > { %v1542_v18 = vpack.c.bf16 %v1540_v17, %v1540_v17 }
 0x385   : > { %3440 = vmatmul.msk.bf16.vlgmr.msra.gmra.mxu3 %vm1519_vm8, %v1542_v18  ;;  %v4003_v18 = vld [vmem:[%s4872_s26 + $0xb0] sm:$0xff] }
 0x389   : > { %v1537_v21 = vpop.xlane.xlu0 %1536 }
 0x38a   : > { %4142 = vrcp.f32 %v1537_v21  ;;  %v3972_v21 = vld [vmem:[%s4366_s5 + $0xb8] sm:$0xff] }
 0x390   : > { %v4143_v24 = vpop.eup %4142 }
 0x391   : > { %v1541_v25 = vmul.f32 %v4143_v24, %v4139_v62  ;;  %v4000_v24 = vld [vmem:[%s4872_s26 + $0x98] sm:$0xff] }
 0x393   : > { %v1543_v26 = vpack.c.bf16 %v1541_v25, %v1541_v25  ;;  %v3970_v25 = vld [vmem:[%s4366_s5 + $0xa8] sm:$0xff] }
 0x395   : > { %3441 = vmatmul.msk.bf16.vlgmr.msrb.gmra.mxu0 %vm1519_vm8, %v1543_v26  ;;  %1773 = vmatmul.bf16.vlgmr.msrb.gmra.mxu3 %v4469_v63  ;;  %v3999_v26 = vld [vmem:[%s4872_s26 + $0x90] sm:$0xff] }
 0x396   : > { %1817 = vmatpush.bf16.xpose.msrb.mxu0 %v1808_v27  ;;  %v3969_v27 = vld [vmem:[%s4366_s5 + $0xa0] sm:$0xff] }
 0x3a5   : > { %3538 = vmatmul.msk.bf16.vlgmr.msra.gmra.mxu0 %vm1472_vm7, %v1779_v32  ;;  %v3967_v32 = vld [vmem:[%s4366_s5 + $0x90] sm:$0xff] }
 0x3a6   : > { %1940 = vmatpush.bf16.msra.mxu0 %v4046_v36  ;;  %v4048_v36 = vld [vmem:[%s4401_s21 + $0x18] sm:$0xff] }
 0x3a7   : > { %1911 = vmatpush.bf16.msra.mxu3 %v4048_v36 }
 0x3aa   : > { %1941 = vmatpush.bf16.msra.mxu0 %v4045_v37 }
 0x3b5   : > { %3539 = vmatmul.msk.bf16.vlgmr.msrb.gmra.mxu0 %vm1472_vm7, %v1780_v35 }
 0x408   : > { %v1560_v38 = vpop.f32.mrf.mxu3 }
 0x410   : > { %v1562_v39 = vpop.f32.mrf.mxu3 }
 0x412   : > { %v1579_v40 = vpop.f32.mrf.mxu0 }
 0x413   : > { %v1583_v41 = vpack.c.bf16 %v1579_v40, %v1560_v38 }
 0x415   : > { %3559 = vmatmul.msk.bf16.vlgmr.msra.gmra.mxu0 %vm1472_vm7, %v1583_v41 }
 0x418   : > { %v1774_v9 = vpop.f32.mrf.mxu3 }
 0x419   : > { %v1775_v10 = vadd.f32 %v4123_v8, %v1774_v9 }
 0x41a   : > { %v1581_v42 = vpop.f32.mrf.mxu0 }
 0x41b   : > { %v1783_v11 = vpack.c.bf16 %v1775_v10, %v1775_v10  ;;  %v4033_v10 = vld [vmem:[%s4386_s1 + $0xa0] sm:$0xff] }
 0x41d   : > { %v1855_v12 = vsel %vm1547_vm9, %v1783_v11, 0 }
 0x41e   : > { %1864 = vmatpush.bf16.msra.mxu1 %v1855_v12 }
 0x420   : > { %v1776_v13 = vpop.f32.mrf.mxu3 }
 0x421   : > { %v1777_v14 = vadd.f32 %v4123_v8, %v1776_v13  ;;  %v4032_v13 = vld [vmem:[%s4386_s1 + $0x98] sm:$0xff] }
 0x422   : > { %v1800_v44 = vpop.f32.mrf.mxu0  ;;  %1999 = vmatpush.bf16.msrb.mxu1 %v3972_v21 }
 0x423   : > { %v1823_v55 = vmul.f32 0.17677669, %v1800_v44  ;;  %v1784_v15 = vpack.c.bf16 %v1777_v14, %v1777_v14  ;;  %v4047_v44 = vld [vmem:[%s4401_s21 + $0x10] sm:$0xff] }
 0x424   : > { %1912 = vmatpush.bf16.msra.mxu3 %v4047_v44 }
 0x425   : > { %v1825_v59 = vadd.f32 %v1823_v55, %v4485_v20  ;;  %v1874_v17 = vsel %vm1547_vm9, %v1784_v15, 0  ;;  %v4031_v15 = vld [vmem:[%s4386_s1 + $0x90] sm:$0xff] }
 0x426   : > { %1883 = vmatpush.bf16.msra.mxu2 %v1874_v17  ;;  %2000 = vmatpush.bf16.msrb.mxu1 %v3971_v23 }
 0x427   : > { %v1827_v60 = vsel %vm1519_vm8, %v1825_v59, -inf }
 0x42a   : > { %v1802_v47 = vpop.f32.mrf.mxu0  ;;  %2064 = vmatpush.bf16.msrb.mxu2 %v4004_v16  ;;  %2001 = vmatpush.bf16.msrb.mxu1 %v3970_v25  ;;  %v4030_v16 = vld [vmem:[%s4386_s1 + $0x88] sm:$0xff] }
 0x42e   : > { %2065 = vmatpush.bf16.msrb.mxu2 %v4003_v18  ;;  %2002 = vmatpush.bf16.msrb.mxu1 %v3969_v27 }
 0x432   : > { %v1819_v50 = vpop.f32.mrf.mxu0  ;;  %2066 = vmatpush.bf16.msrb.mxu2 %v4002_v19  ;;  %2003 = vmatpush.bf16.msrb.mxu1 %v3968_v29  ;;  %v4029_v19 = vld [vmem:[%s4386_s1 + $0x80] sm:$0xff] }
 0x433   : > { %v1824_v52 = vmul.f32 0.17677669, %v1819_v50  ;;  %v4124_v50 = vld [vmem:[%s4873_s27 + $0x2] ss:$0 sm:$0xff] }
 0x435   : > { %v1826_v53 = vadd.f32 %v1824_v52, %v4493_v31 }
 0x436   : > { %2067 = vmatpush.bf16.msrb.mxu2 %v4001_v22  ;;  %2004 = vmatpush.bf16.msrb.mxu1 %v3967_v32 }
 0x437   : > { %v1830_v56 = vsel %vm1519_vm8, %v1826_v53, -inf }
 0x438   : > { %1831 = vmax.xlane.f32.xlu2 %v1830_v56 }
 0x43a   : > { %v1821_v57 = vpop.f32.mrf.mxu0  ;;  %2068 = vmatpush.bf16.msrb.mxu2 %v4000_v24  ;;  %2005 = vmatpush.bf16.msrb.mxu1 %v3966_v33 }
 0x43e   : > { %2069 = vmatpush.bf16.msrb.mxu2 %v3999_v26  ;;  %2006 = vmatpush.bf16.msrb.mxu1 %v3965_v34 }
 0x440   : > { %1828 = vmax.xlane.f32.xlu2 %v1827_v60 }
 0x442   : > { %2070 = vmatpush.bf16.msrb.mxu2 %v3998_v28 }
 0x446   : > { %2071 = vmatpush.bf16.msrb.mxu2 %v3997_v30 }
 0x4ab   : > { %v1832_v61 = vpop.xlane.xlu2 %1831 }
 0x4ac   : > { %v1834_v62 = vsub.f32 %v1826_v53, %v1832_v61  ;;  %v4125_v53 = vld [vmem:[%s4874_s3 + $0x2] ss:$0 sm:$0xff] }
 0x4ae   : > { %v1837_v0 = vmul.f32 1.442695, %v1834_v62 }
 0x4b0   : > { %4144 = vpow2.f32 %v1837_v0 }
 0x4b3   : > { %v1829_v1 = vpop.xlane.xlu2 %1828 }
 0x4b4   : > { %v1833_v2 = vsub.f32 %v1825_v59, %v1829_v1 }
 0x4b6   : > { %v4145_v3 = vpop.eup %4144  ;;  %v1835_v4 = vmul.f32 1.442695, %v1833_v2 }
 0x4b7   : > { %v1842_v5 = vsel %vm1519_vm8, %v4145_v3, 0.0 }
 0x4b8   : > { %4146 = vpow2.f32 %v1835_v4  ;;  %1843 = vadd.xlane.f32.xlu0 %v1842_v5  ;;  %v4036_v5 = vld [vmem:[%s4386_s1 + $0xb8] sm:$0xff] }
 0x4b9   : > { %2129 = vmatpush.bf16.msrb.mxu3 %v4036_v5 }
 0x4be   : > { %v4147_v6 = vpop.eup %4146 }
 0x4bf   : > { %v1839_v7 = vsel %vm1519_vm8, %v4147_v6, 0.0 }
 0x4c0   : > { %1840 = vadd.xlane.f32.xlu1 %v1839_v7  ;;  %v4034_v7 = vld [vmem:[%s4386_s1 + $0xa8] sm:$0xff] }
 0x52b   : > { %v1844_v35 = vpop.xlane.xlu0 %1843 }
 0x52c   : > { %4148 = vrcp.f32 %v1844_v35 }
 0x532   : > { %v4149_v37 = vpop.eup %4148 }
 0x533   : > { %v1848_v38 = vmul.f32 %v4149_v37, %v4145_v3  ;;  %v1841_v39 = vpop.xlane.xlu1 %1840  ;;  %v4580_v3 = vpop.f32.mrf.mxu0  ;;  %v4126_v37 = vld [vmem:[%s4391_s25 + $0x2] ss:$0 sm:$0xff] }
 0x534   : > { %4150 = vrcp.f32 %v1841_v39 }
 0x535   : > { %v1850_v40 = vpack.c.bf16 %v1848_v38, %v1848_v38 }
 0x537   : > { %3541 = vmatmul.msk.bf16.vlgmr.msra.gmra.mxu2 %vm1519_vm8, %v1850_v40 }
 0x53a   : > { %v4151_v41 = vpop.eup %4150 }
 0x53b   : > { %v1847_v42 = vmul.f32 %v4151_v41, %v4147_v6  ;;  %v4582_v4 = vpop.f32.mrf.mxu0  ;;  %v4035_v6 = vld [vmem:[%s4386_s1 + $0xb0] sm:$0xff] }
 0x53c   : > { %2130 = vmatpush.bf16.msrb.mxu3 %v4035_v6 }
 0x53d   : > { %v1849_v43 = vpack.c.bf16 %v1847_v42, %v1847_v42  ;;  %v4012_v42 = vld [vmem:[%s4872_s26 + $0xf8] sm:$0xff] }
 0x53f   : > { %3540 = vmatmul.msk.bf16.vlgmr.msra.gmra.mxu1 %vm1519_vm8, %v1849_v43 }
 0x540   : > { %2131 = vmatpush.bf16.msrb.mxu3 %v4034_v7 }
 0x544   : > { %2132 = vmatpush.bf16.msrb.mxu3 %v4033_v10  ;;  %v4049_v10 = vld [vmem:[%s4401_s21 + $0x20] sm:$0xff] }
 0x547   : > { %2072 = vmatmul.bf16.vlgmr.msrb.gmra.mxu2 %v4469_v63 }
 0x548   : > { %2133 = vmatpush.bf16.msrb.mxu3 %v4032_v13  ;;  %v4127_v13 = vld [vmem:[%s4873_s27 + $0x3] ss:$0 sm:$0xff] }
 0x54c   : > { %2134 = vmatpush.bf16.msrb.mxu3 %v4031_v15 }
 0x54f   : > { %2007 = vmatmul.bf16.vlgmr.msrb.gmra.mxu1 %v4469_v63 }
 0x550   : > { %2135 = vmatpush.bf16.msrb.mxu3 %v4030_v16 }
 0x554   : > { %2136 = vmatpush.bf16.msrb.mxu3 %v4029_v19 }
 0x5ba   : > { %v1885_v45 = vpop.f32.mrf.mxu2 }
 0x5bc   : > { %v1866_v46 = vpop.f32.mrf.mxu1 }
 0x5bd   : > { %v1889_v47 = vpack.c.bf16 %v1885_v45, %v1866_v46  ;;  %v4011_v45 = vld [vmem:[%s4872_s26 + $0xf0] sm:$0xff] }
 0x5bf   : > { %3550 = vmatmul.msk.bf16.vlgmr.msra.gmra.mxu3 %vm1472_vm7, %v1889_v47 }
 0x5c2   : > { %v1887_v48 = vpop.f32.mrf.mxu2 }
 0x5c3   : > { %v4010_v48 = vld [vmem:[%s4872_s26 + $0xe8] sm:$0xff] }
 0x5c4   : > { %v1868_v49 = vpop.f32.mrf.mxu1 }
 0x5c5   : > { %v3980_v49 = vld [vmem:[%s4366_s5 + $0xf8] sm:$0xff] }
 0x5ca   : > { %v2073_v51 = vpop.f32.mrf.mxu2 }
 0x5cb   : > { %v2074_v52 = vadd.f32 %v4124_v50, %v2073_v51  ;;  %v3979_v51 = vld [vmem:[%s4366_s5 + $0xf0] sm:$0xff] }
 0x5cc   : > { %v2008_v55 = vpop.f32.mrf.mxu1 }
 0x5cd   : > { %v2145_v54 = vpack.c.bf16 %v2074_v52, %v2074_v52  ;;  %v2009_v57 = vadd.f32 %v4125_v53, %v2008_v55  ;;  %v4008_v52 = vld [vmem:[%s4872_s26 + $0xd8] sm:$0xff]  ;;  %v3977_v55 = vld [vmem:[%s4366_s5 + $0xe0] sm:$0xff] }
 0x5cf   : > { %v2153_v56 = vsel %vm1472_vm7, %v2145_v54, 0  ;;  %v2143_v59 = vpack.c.bf16 %v2009_v57, %v2009_v57  ;;  %2137 = vmatmul.bf16.vlgmr.msrb.gmra.mxu3 %v4469_v63  ;;  %v4007_v54 = vld [vmem:[%s4872_s26 + $0xd0] sm:$0xff]  ;;  %v3976_v57 = vld [vmem:[%s4366_s5 + $0xd8] sm:$0xff] }
 0x5d0   : > { %2162 = vmatpush.bf16.xpose.msrb.mxu0 %v2153_v56  ;;  %v4006_v56 = vld [vmem:[%s4872_s26 + $0xc8] sm:$0xff] }
 0x5d2   : > { %v2075_v58 = vpop.f32.mrf.mxu2 }
 0x5d3   : > { %v2076_v60 = vadd.f32 %v4124_v50, %v2075_v58  ;;  %v4009_v50 = vld [vmem:[%s4872_s26 + $0xe0] sm:$0xff] }
 0x5d4   : > { %v2010_v0 = vpop.f32.mrf.mxu1  ;;  %v4005_v58 = vld [vmem:[%s4872_s26 + $0xc0] sm:$0xff] }
 0x5d5   : > { %v2146_v61 = vpack.c.bf16 %v2076_v60, %v2076_v60  ;;  %v2011_v1 = vadd.f32 %v4125_v53, %v2010_v0  ;;  %v3978_v53 = vld [vmem:[%s4366_s5 + $0xe8] sm:$0xff] }
 0x5d6   : > { %v3974_v60 = vld [vmem:[%s4366_s5 + $0xc8] sm:$0xff] }
 0x5d7   : > { %v2172_v62 = vsel %vm1472_vm7, %v2146_v61, 0  ;;  %3656 = vmatmul.msk.bf16.vlgmr.msrb.gmra.mxu0 %vm1472_vm7, %v2143_v59  ;;  %v2144_v2 = vpack.c.bf16 %v2011_v1, %v2011_v1  ;;  %v3975_v59 = vld [vmem:[%s4366_s5 + $0xd0] sm:$0xff] }
 0x5d8   : > { %2181 = vmatpush.bf16.xpose.msra.mxu0 %v2172_v62  ;;  %v3973_v62 = vld [vmem:[%s4366_s5 + $0xc0] sm:$0xff] }
 0x5e0   : > { %2336 = vmatpush.bf16.msrb.mxu0 %v3980_v49  ;;  %v4038_v49 = vld [vmem:[%s4386_s1 + $0xc8] sm:$0xff] }
 0x5e4   : > { %2337 = vmatpush.bf16.msrb.mxu0 %v3979_v51 }
 0x5e7   : > { %3657 = vmatmul.msk.bf16.vlgmr.msra.gmra.mxu0 %vm1472_vm7, %v2144_v2 }
 0x5e8   : > { %2338 = vmatpush.bf16.msrb.mxu0 %v3978_v53 }
 0x5ec   : > { %2339 = vmatpush.bf16.msrb.mxu0 %v3977_v55 }
 0x5f0   : > { %2340 = vmatpush.bf16.msrb.mxu0 %v3976_v57 }
 0x5f4   : > { %2341 = vmatpush.bf16.msrb.mxu0 %v3975_v59 }
 0x5f8   : > { %2342 = vmatpush.bf16.msrb.mxu0 %v3974_v60 }
 0x5fc   : > { %2343 = vmatpush.bf16.msrb.mxu0 %v3973_v62 }
 0x5ff   : > { %2344 = vmatmul.bf16.vlgmr.msrb.gmra.mxu0 %v4469_v63 }
 0x642   : > { %v4598_v30 = vpop.f32.mrf.mxu3 }
 0x64a   : > { %v4600_v35 = vpop.f32.mrf.mxu3 }
 0x652   : > { %v2138_v38 = vpop.f32.mrf.mxu3 }
 0x653   : > { %v2139_v39 = vadd.f32 %v4126_v37, %v2138_v38 }
 0x654   : > { %v2164_v8 = vpop.f32.mrf.mxu0 }
 0x655   : > { %v2187_v9 = vmul.f32 0.17677669, %v2164_v8  ;;  %v2147_v40 = vpack.c.bf16 %v2139_v39, %v2139_v39  ;;  %v1946_v39 = vadd.f32 %v4582_v4, %v4600_v35  ;;  %v4040_v35 = vld [vmem:[%s4386_s1 + $0xd8] sm:$0xff] }
 0x657   : > { %v2189_v11 = vadd.f32 %v2187_v9, %v4485_v20  ;;  %v2219_v41 = vsel %vm1547_vm9, %v2147_v40, 0  ;;  %v4050_v9 = vld [vmem:[%s4401_s21 + $0x28] sm:$0xff] }
 0x658   : > { %2228 = vmatpush.bf16.msra.mxu1 %v2219_v41  ;;  %2275 = vmatpush.bf16.msra.mxu3 %v4050_v9  ;;  %v4044_v41 = vld [vmem:[%s4386_s1 + $0xf8] sm:$0xff] }
 0x659   : > { %v2191_v12 = vsel %vm1519_vm8, %v2189_v11, -inf }
 0x65a   : > { %2192 = vmax.xlane.f32.xlu2 %v2191_v12  ;;  %v2140_v43 = vpop.f32.mrf.mxu3 }
 0x65b   : > { %v2141_v44 = vadd.f32 %v4126_v37, %v2140_v43  ;;  %v4043_v43 = vld [vmem:[%s4386_s1 + $0xf0] sm:$0xff] }
 0x65c   : > { %v2166_v14 = vpop.f32.mrf.mxu0  ;;  %2401 = vmatpush.bf16.msrb.mxu1 %v4012_v42  ;;  %2276 = vmatpush.bf16.msra.mxu3 %v4049_v10 }
 0x65d   : > { %v2148_v46 = vpack.c.bf16 %v2141_v44, %v2141_v44  ;;  %v4042_v44 = vld [vmem:[%s4386_s1 + $0xe8] sm:$0xff] }
 0x65f   : > { %v2238_v47 = vsel %vm1547_vm9, %v2148_v46, 0 }
 0x660   : > { %2402 = vmatpush.bf16.msrb.mxu1 %v4011_v45  ;;  %2247 = vmatpush.bf16.msra.mxu2 %v2238_v47 }
 0x664   : > { %v2183_v17 = vpop.f32.mrf.mxu0  ;;  %2403 = vmatpush.bf16.msrb.mxu1 %v4010_v48  ;;  %2466 = vmatpush.bf16.msrb.mxu2 %v4044_v41  ;;  %v4039_v48 = vld [vmem:[%s4386_s1 + $0xd0] sm:$0xff] }
 0x665   : > { %v2188_v18 = vmul.f32 0.17677669, %v2183_v17 }
 0x667   : > { %v2190_v21 = vadd.f32 %v2188_v18, %v4493_v31 }
 0x668   : > { %2404 = vmatpush.bf16.msrb.mxu1 %v4009_v50  ;;  %2467 = vmatpush.bf16.msrb.mxu2 %v4043_v43  ;;  %v4230_v43 = vmov 128.0  }
 0x669   : > { %v2194_v22 = vsel %vm1519_vm8, %v2190_v21, -inf }
 0x66a   : > { %2195 = vmax.xlane.f32.xlu0 %v2194_v22 }
 0x66c   : > { %v2185_v23 = vpop.f32.mrf.mxu0  ;;  %2405 = vmatpush.bf16.msrb.mxu1 %v4008_v52  ;;  %2468 = vmatpush.bf16.msrb.mxu2 %v4042_v44  ;;  %v4037_v52 = vld [vmem:[%s4386_s1 + $0xc0] sm:$0xff] }
 0x670   : > { %2406 = vmatpush.bf16.msrb.mxu1 %v4007_v54 }
 0x674   : > { %2407 = vmatpush.bf16.msrb.mxu1 %v4006_v56 }
 0x678   : > { %2408 = vmatpush.bf16.msrb.mxu1 %v4005_v58 }
 0x6cd   : > { %v2193_v24 = vpop.xlane.xlu2 %2192 }
 0x6ce   : > { %v2197_v25 = vsub.f32 %v2189_v11, %v2193_v24 }
 0x6d0   : > { %v2199_v26 = vmul.f32 1.442695, %v2197_v25  ;;  %v4128_v25 = vld [vmem:[%s4874_s3 + $0x3] ss:$0 sm:$0xff] }
 0x6d2   : > { %4152 = vpow2.f32 %v2199_v26 }
 0x6d8   : > { %v4153_v27 = vpop.eup %4152 }
 0x6d9   : > { %v2203_v28 = vsel %vm1519_vm8, %v4153_v27, 0.0 }
 0x6da   : > { %2204 = vadd.xlane.f32.xlu1 %v2203_v28 }
 0x6dd   : > { %v2196_v29 = vpop.xlane.xlu0 %2195 }
 0x6de   : > { %v2198_v32 = vsub.f32 %v2190_v21, %v2196_v29 }
 0x6e0   : > { %v2201_v33 = vmul.f32 1.442695, %v2198_v32 }
 0x6e2   : > { %4154 = vpow2.f32 %v2201_v33 }
 0x6e8   : > { %v4155_v34 = vpop.eup %4154 }
 0x6e9   : > { %v2206_v36 = vsel %vm1519_vm8, %v4155_v34, 0.0 }
 0x6ea   : > { %2207 = vadd.xlane.f32.xlu2 %v2206_v36  ;;  %v1944_v36 = vadd.f32 %v4580_v3, %v4598_v30  ;;  %v4041_v3 = vld [vmem:[%s4386_s1 + $0xe0] sm:$0xff] }
 0x6eb   : > { %2469 = vmatpush.bf16.msrb.mxu2 %v4041_v3 }
 0x6ef   : > { %2470 = vmatpush.bf16.msrb.mxu2 %v4040_v35 }
 0x6f3   : > { %2471 = vmatpush.bf16.msrb.mxu2 %v4039_v48 }
 0x6f7   : > { %2472 = vmatpush.bf16.msrb.mxu2 %v4038_v49 }
 0x6fb   : > { %2473 = vmatpush.bf16.msrb.mxu2 %v4037_v52  ;;  %v3836_v52 = vld [vmem:[%s4415_s9 + $0x70] sm:$0xf] }
 0x74d   : > { %v2205_v61 = vpop.xlane.xlu1 %2204 }
 0x74e   : > { %4156 = vrcp.f32 %v2205_v61 }
 0x754   : > { %v4157_v0 = vpop.eup %4156 }
 0x755   : > { %v2211_v1 = vmul.f32 %v4157_v0, %v4153_v27  ;;  %v2345_v27 = vpop.f32.mrf.mxu0 }
 0x756   : > { %v2346_v28 = vadd.f32 %v4128_v25, %v2345_v27 }
 0x757   : > { %v2213_v2 = vpack.c.bf16 %v2211_v1, %v2211_v1  ;;  %v4129_v1 = vld [vmem:[%s4391_s25 + $0x3] ss:$0 sm:$0xff]  ;;  %s4876_s25 = scalar_lea.vmem %s4821_s11, %s4359_s29 }
 0x758   : > { %v2480_v29 = vpack.c.bf16 %v2346_v28, %v2346_v28  ;;  %v4130_v27 = vld [vmem:[%s4876_s25] ss:$0 sm:$0xff] }
 0x759   : > { %3658 = vmatmul.msk.bf16.vlgmr.msra.gmra.mxu1 %vm1519_vm8, %v2213_v2 }
 0x75d   : > { %v2208_v5 = vpop.xlane.xlu2 %2207  ;;  %v2347_v32 = vpop.f32.mrf.mxu0 }
 0x75e   : > { %4158 = vrcp.f32 %v2208_v5  ;;  %v2348_v33 = vadd.f32 %v4128_v25, %v2347_v32 }
 0x764   : > { %v4159_v6 = vpop.eup %4158 }
 0x765   : > { %v2212_v7 = vmul.f32 %v4159_v6, %v4155_v34  ;;  %v2481_v34 = vpack.c.bf16 %v2348_v33, %v2348_v33  ;;  %v4186_v33 = vld [vmem:[#allocation2] sm:$0xff] }
 0x767   : > { %v2214_v8 = vpack.c.bf16 %v2212_v7, %v2212_v7 }
 0x769   : > { %3659 = vmatmul.msk.bf16.vlgmr.msra.gmra.mxu2 %vm1519_vm8, %v2214_v8  ;;  %2409 = vmatmul.bf16.vlgmr.msrb.gmra.mxu1 %v4469_v63 }
 0x779   : > { %2474 = vmatmul.bf16.vlgmr.msrb.gmra.mxu2 %v4469_v63 }
 0x7d6   : > { %v2230_v11 = vpop.f32.mrf.mxu1 }
 0x7de   : > { %v2232_v12 = vpop.f32.mrf.mxu1 }
 0x7e6   : > { %v2410_v14 = vpop.f32.mrf.mxu1 }
 0x7e7   : > { %v2411_v15 = vadd.f32 %v4127_v13, %v2410_v14 }
 0x7e9   : > { %v2482_v16 = vpack.c.bf16 %v2411_v15, %v2411_v15 }
 0x7eb   : > { %v2490_v17 = vsel %vm1472_vm7, %v2482_v16, 0 }
 0x7ec   : > { %v2249_v18 = vpop.f32.mrf.mxu2  ;;  %2499 = vmatpush.bf16.xpose.msrb.mxu3 %v2490_v17 }
 0x7ed   : > { %v2253_v19 = vpack.c.bf16 %v2249_v18, %v2230_v11 }
 0x7ee   : > { %v2412_v21 = vpop.f32.mrf.mxu1 }
 0x7ef   : > { %3668 = vmatmul.msk.bf16.vlgmr.msra.gmra.mxu3 %vm1472_vm7, %v2253_v19  ;;  %v2413_v22 = vadd.f32 %v4127_v13, %v2412_v21  ;;  %v4052_v19 = vld [vmem:[%s4401_s21 + $0x38] sm:$0xff]  ;;  %v4051_v21 = vld [vmem:[%s4401_s21 + $0x30] sm:$0xff] }
 0x7f0   : > { %2612 = vmatpush.bf16.msra.mxu2 %v4052_v19  ;;  %v4058_v19 = vld [vmem:[%s4415_s9 + $0x24] sm:$0xf0] }
 0x7f1   : > { %v2483_v23 = vpack.c.bf16 %v2413_v22, %v2413_v22 }
 0x7f3   : > { %v2509_v24 = vsel %vm1472_vm7, %v2483_v23, 0 }
 0x7f4   : > { %v2251_v26 = vpop.f32.mrf.mxu2  ;;  %2518 = vmatpush.bf16.xpose.msra.mxu3 %v2509_v24  ;;  %2613 = vmatpush.bf16.msra.mxu2 %v4051_v21  ;;  %v4057_v21 = vld [vmem:[%s4415_s9 + $0x24] sm:$0xf] }
 0x7fc   : > { %v2475_v2 = vpop.f32.mrf.mxu2 }
 0x7fd   : > { %v2476_v5 = vadd.f32 %v4129_v1, %v2475_v2 }
 0x7ff   : > { %3765 = vmatmul.msk.bf16.vlgmr.msrb.gmra.mxu3 %vm1472_vm7, %v2480_v29  ;;  %v2484_v63 = vpack.c.bf16 %v2476_v5, %v2476_v5  ;;  %v3822_v5 = vld [vmem:[%s4415_s9 + $0x58] sm:$0xf0] }
 0x801   : > { %v2556_v6 = vsel %vm1547_vm9, %v2484_v63, 0 }
 0x802   : > { %2565 = vmatpush.bf16.msra.mxu0 %v2556_v6  ;;  %v3812_v6 = vld [vmem:[%s4415_s9 + $0x40] sm:$0xf] }
 0x804   : > { %v2477_v7 = vpop.f32.mrf.mxu2 }
 0x805   : > { %v2478_v8 = vadd.f32 %v4129_v1, %v2477_v7  ;;  %v4063_v1 = vld [vmem:[%s4415_s9 + $0x54] sm:$0xf]  ;;  %v4062_v7 = vld [vmem:[%s4415_s9 + $0x44] sm:$0xf0] }
 0x806   : > { %v3825_v63 = vor.u32 %v4063_v1, %v3822_v5  ;;  %v4076_v5 = vld [vmem:[%s4426_s7 + $0x38] sm:$0xff] }
 0x807   : > { %v2485_v9 = vpack.c.bf16 %v2478_v8, %v2478_v8  ;;  %v4061_v8 = vld [vmem:[%s4415_s9 + $0x44] sm:$0xf] }
 0x809   : > { %v2575_v10 = vsel %vm1547_vm9, %v2485_v9, 0  ;;  %v3813_v9 = vor.u32 %v4062_v7, %v3812_v6  ;;  %v4075_v6 = vld [vmem:[%s4426_s7 + $0x30] sm:$0xff]  ;;  %v4081_v7 = vld [vmem:[%s4426_s7 + $0x60] sm:$0xff] }
 0x80a   : > { %2584 = vmatpush.bf16.msra.mxu1 %v2575_v10  ;;  %v3814_v10 = vld [vmem:[%s4415_s9 + $0x48] sm:$0xf0] }
 0x80e   : > { %2937 = vmatpush.bf16.msrb.mxu1 %v4076_v5 }
 0x80f   : > { %3766 = vmatmul.msk.bf16.vlgmr.msra.gmra.mxu3 %vm1472_vm7, %v2481_v34 }
 0x812   : > { %2938 = vmatpush.bf16.msrb.mxu1 %v4075_v6  ;;  %v4133_v6 = vld [vmem:[%s915_s23] ss:$0 sm:$0xff] }
 0x872   : > { %v2278_v37 = vpop.f32.mrf.mxu3 }
 0x873   : > { %v4637_v38 = vadd.f32 %v2278_v37, %v1944_v36 }
 0x87a   : > { %v2280_v40 = vpop.f32.mrf.mxu3 }
 0x87b   : > { %v4642_v42 = vadd.f32 %v2280_v40, %v1946_v39  ;;  %v4187_v40 = vld [vmem:[#allocation2 + $0x8] sm:$0xff] }
 0x882   : > { %v2501_v45 = vpop.f32.mrf.mxu3 }
 0x883   : > { %v2524_v46 = vmul.f32 0.17677669, %v2501_v45 }
 0x885   : > { %v2526_v30 = vadd.f32 %v2524_v46, %v4485_v20 }
 0x887   : > { %v2528_v4 = vsel %vm1519_vm8, %v2526_v30, -inf }
 0x888   : > { %2529 = vmax.xlane.f32.xlu0 %v2528_v4 }
 0x88a   : > { %v2503_v47 = vpop.f32.mrf.mxu3 }
 0x892   : > { %v2520_v50 = vpop.f32.mrf.mxu3 }
 0x893   : > { %v2525_v51 = vmul.f32 0.17677669, %v2520_v50 }
 0x895   : > { %v2527_v53 = vadd.f32 %v2525_v51, %v4493_v31 }
 0x897   : > { %v2531_v54 = vsel %vm1519_vm8, %v2527_v53, -inf }
 0x898   : > { %2532 = vmax.xlane.f32.xlu1 %v2531_v54  ;;  %v4067_v54 = vld [vmem:[%s4415_s9 + $0x74] sm:$0xf] }
 0x89a   : > { %v2522_v20 = vpop.f32.mrf.mxu3 }
 0x8fb   : > { %v2530_v55 = vpop.xlane.xlu0 %2529 }
 0x8fc   : > { %v2534_v56 = vsub.f32 %v2526_v30, %v2530_v55  ;;  %v3838_v55 = vld [vmem:[%s4415_s9 + $0x78] sm:$0xf0] }
 0x8fe   : > { %v2536_v57 = vmul.f32 1.442695, %v2534_v56  ;;  %v3841_v56 = vor.u32 %v4067_v54, %v3838_v55 }
 0x900   : > { %4160 = vpow2.f32 %v2536_v57  ;;  %2786 = vmatpush.bf16.msrb.mxu0 %v3841_v56  ;;  %v3828_v57 = vld [vmem:[%s4415_s9 + $0x60] sm:$0xf] }
 0x906   : > { %v4161_v58 = vpop.eup %4160 }
 0x907   : > { %v2540_v59 = vsel %vm1519_vm8, %v4161_v58, 0.0 }
 0x908   : > { %2541 = vadd.xlane.f32.xlu2 %v2540_v59  ;;  %v4065_v59 = vld [vmem:[%s4415_s9 + $0x64] sm:$0xf] }
 0x90b   : > { %v2533_v60 = vpop.xlane.xlu1 %2532 }
 0x90c   : > { %v2535_v61 = vsub.f32 %v2527_v53, %v2533_v60  ;;  %v4068_v53 = vld [vmem:[%s4415_s9 + $0x74] sm:$0xf0] }
 0x90d   : > { %v3837_v20 = vor.u32 %v4068_v53, %v3836_v52 }
 0x90e   : > { %v2538_v62 = vmul.f32 1.442695, %v2535_v61  ;;  %v3830_v61 = vld [vmem:[%s4415_s9 + $0x68] sm:$0xf0] }
 0x90f   : > { %2772 = vmatpush.bf16.msrb.mxu3 %v3837_v20 }
 0x910   : > { %4162 = vpow2.f32 %v2538_v62  ;;  %v3833_v62 = vor.u32 %v4065_v59, %v3830_v61 }
 0x912   : > { %2787 = vmatpush.bf16.msrb.mxu0 %v3833_v62 }
 0x916   : > { %v4163_v31 = vpop.eup %4162  ;;  %2788 = vmatpush.bf16.msrb.mxu0 %v3825_v63  ;;  %v4082_v63 = vld [vmem:[%s4426_s7 + $0x68] sm:$0xff] }
 0x917   : > { %v2543_v0 = vsel %vm1519_vm8, %v4163_v31, 0.0 }
 0x918   : > { %2544 = vadd.xlane.f32.xlu0 %v2543_v0  ;;  %v4064_v0 = vld [vmem:[%s4415_s9 + $0x54] sm:$0xf0] }
 0x97b   : > { %v2542_v11 = vpop.xlane.xlu2 %2541 }
 0x97c   : > { %4164 = vrcp.f32 %v2542_v11  ;;  %v3817_v11 = vor.u32 %v4061_v8, %v3814_v10  ;;  %v4074_v8 = vld [vmem:[%s4426_s7 + $0x28] sm:$0xff]  ;;  %v4073_v10 = vld [vmem:[%s4426_s7 + $0x20] sm:$0xff] }
 0x97d   : > { %2939 = vmatpush.bf16.msrb.mxu1 %v4074_v8 }
 0x97e   : > { %2789 = vmatpush.bf16.msrb.mxu0 %v3817_v11  ;;  %v4079_v11 = vld [vmem:[%s4426_s7 + $0x50] sm:$0xff] }
 0x981   : > { %2940 = vmatpush.bf16.msrb.mxu1 %v4073_v10 }
 0x982   : > { %v4165_v12 = vpop.eup %4164 }
 0x983   : > { %v2548_v13 = vmul.f32 %v4165_v12, %v4161_v58  ;;  %v4066_v58 = vld [vmem:[%s4415_s9 + $0x64] sm:$0xf0]  ;;  %v3804_v12 = vld [vmem:[%s4415_s9 + $0x30] sm:$0xf] }
 0x984   : > { %v3829_v60 = vor.u32 %v4066_v58, %v3828_v57  ;;  %v4131_v57 = vld [vmem:[%s4877_s30] ss:$0 sm:$0xff] }
 0x985   : > { %v2550_v14 = vpack.c.bf16 %v2548_v13, %v2548_v13  ;;  %v4060_v13 = vld [vmem:[%s4415_s9 + $0x34] sm:$0xf0] }
 0x986   : > { %2773 = vmatpush.bf16.msrb.mxu3 %v3829_v60 }
 0x987   : > { %3767 = vmatmul.msk.bf16.vlgmr.msra.gmra.mxu0 %vm1519_vm8, %v2550_v14  ;;  %v4059_v14 = vld [vmem:[%s4415_s9 + $0x34] sm:$0xf] }
 0x98b   : > { %v2545_v15 = vpop.xlane.xlu0 %2544 }
 0x98c   : > { %4166 = vrcp.f32 %v2545_v15  ;;  %v3805_v15 = vor.u32 %v4060_v13, %v3804_v12  ;;  %v4072_v12 = vld [vmem:[%s4426_s7 + $0x18] sm:$0xff]  ;;  %v4078_v13 = vld [vmem:[%s4426_s7 + $0x48] sm:$0xff] }
 0x98d   : > { %4168 = vrcp.f32 %v4230_v43  ;;  %2941 = vmatpush.bf16.msrb.mxu1 %v4072_v12 }
 0x992   : > { %v4167_v16 = vpop.eup %4166 }
 0x993   : > { %v2549_v17 = vmul.f32 %v4167_v16, %v4163_v31  ;;  %v4169_v44 = vpop.eup %4168  ;;  %v3820_v31 = vld [vmem:[%s4415_s9 + $0x50] sm:$0xf]  ;;  %v3806_v16 = vld [vmem:[%s4415_s9 + $0x38] sm:$0xf0] }
 0x994   : > { %v2634_v45 = vmul.f32 128.0, %v4169_v44  ;;  %vm2638_vm10 = vweird.f32 %v4169_v44  ;;  %v3821_v2 = vor.u32 %v4064_v0, %v3820_v31 }
 0x995   : > { %v2551_v18 = vpack.c.bf16 %v2549_v17, %v2549_v17  ;;  %v3809_v17 = vor.u32 %v4059_v14, %v3806_v16  ;;  %v4071_v14 = vld [vmem:[%s4426_s7 + $0x10] sm:$0xff]  ;;  %v4077_v16 = vld [vmem:[%s4426_s7 + $0x40] sm:$0xff] }
 0x996   : > { %v2635_v46 = vsub.f32 1.0, %v2634_v45  ;;  %2774 = vmatpush.bf16.msrb.mxu3 %v3821_v2  ;;  %v4083_v2 = vld [vmem:[%s4426_s7 + $0x70] sm:$0xff]  ;;  %2942 = vmatpush.bf16.msrb.mxu1 %v4071_v14 }
 0x997   : > { %3768 = vmatmul.msk.bf16.vlgmr.msra.gmra.mxu1 %vm1519_vm8, %v2551_v18  ;;  %2790 = vmatpush.bf16.msrb.mxu0 %v3809_v17  ;;  %v3796_v18 = vld [vmem:[%s4415_s9 + $0x20] sm:$0xf] }
 0x998   : > { %v2636_v3 = vmul.f32 %v4169_v44, %v2635_v46 }
 0x99a   : > { %2775 = vmatpush.bf16.msrb.mxu3 %v3813_v9  ;;  %v4080_v9 = vld [vmem:[%s4426_s7 + $0x58] sm:$0xff] }
 0x99e   : > { %2776 = vmatpush.bf16.msrb.mxu3 %v3805_v15  ;;  %v1235_v15 = vld [vmem:[%s4421_s22] sm:$0x3] }
 0x99f   : > { %v2689_v17 = vperm.slane %v1235_v15, 1 }
 0xa04   : > { %v2567_v22 = vpop.f32.mrf.mxu0 }
 0xa0c   : > { %v2569_v23 = vpop.f32.mrf.mxu0 }
 0xa0d   : > { %v3798_v23 = vld [vmem:[%s4415_s9 + $0x28] sm:$0xf0] }
 0xa14   : > { %v2586_v24 = vpop.f32.mrf.mxu1 }
 0xa15   : > { %v2590_v25 = vpack.c.bf16 %v2586_v24, %v2567_v22  ;;  %v3797_v22 = vor.u32 %v4058_v19, %v3796_v18  ;;  %v3801_v24 = vor.u32 %v4057_v21, %v3798_v23  ;;  %v4070_v18 = vld [vmem:[%s4426_s7 + $0x8] sm:$0xff] }
 0xa16   : > { %2943 = vmatpush.bf16.msrb.mxu1 %v4070_v18 }
 0xa17   : > { %3777 = vmatmul.msk.bf16.vlgmr.msra.gmra.mxu2 %vm1472_vm7, %v2590_v25  ;;  %2777 = vmatpush.bf16.msrb.mxu3 %v3797_v22  ;;  %v3788_v25 = vld [vmem:[%s4415_s9 + $0x10] sm:$0xf]  ;;  %v4069_v22 = vld [vmem:[%s4426_s7] sm:$0xff] }
 0xa18   : > { %2791 = vmatpush.bf16.msrb.mxu0 %v3801_v24  ;;  %v2688_v24 = vperm.slane %v1235_v15, 0 }
 0xa1a   : > { %2944 = vmatpush.bf16.msrb.mxu1 %v4069_v22 }
 0xa1c   : > { %v2588_v26 = vpop.f32.mrf.mxu1 }
 0xa1d   : > { %v4056_v26 = vld [vmem:[%s4415_s9 + $0x14] sm:$0xf0] }
 0xa9a   : > { %v2615_v28 = vpop.f32.mrf.mxu2 }
 0xa9b   : > { %v2620_v29 = vadd.f32 %v2615_v28, %v4637_v38  ;;  %v2637_v38 = vadd.f32 %v4169_v44, %v2636_v3  ;;  %v3789_v28 = vor.u32 %v4056_v26, %v3788_v25 }
 0xa9d   : > { %v2625_v32 = vadd.f32 %v4130_v27, %v2620_v29  ;;  %v4673_v30 = vsel %vm2638_vm10, %v4169_v44, %v2637_v38  ;;  %v3790_v29 = vld [vmem:[%s4415_s9 + $0x18] sm:$0xf0]  ;;  %2778 = vmatpush.bf16.msrb.mxu3 %v3789_v28 }
 0xa9f   : > { %v2627_v34 = vadd.f32 %v4186_v33, %v2625_v32  ;;  %v3780_v33 = vld [vmem:[%s4415_s9] sm:$0xf] }
 0xaa1   : > { %2629 = vadd.xlane.f32.xlu1 %v2627_v34 }
 0xaa2   : > { %v2617_v36 = vpop.f32.mrf.mxu2 }
 0xaa3   : > { %v2621_v37 = vadd.f32 %v2617_v36, %v4642_v42  ;;  %v4053_v36 = vld [vmem:[%s4415_s9 + $0x4] sm:$0xf] }
 0xaa5   : > { %v2626_v39 = vadd.f32 %v4130_v27, %v2621_v37  ;;  %v4055_v27 = vld [vmem:[%s4415_s9 + $0x14] sm:$0xf] }
 0xaa6   : > { %v3793_v32 = vor.u32 %v4055_v27, %v3790_v29 }
 0xaa7   : > { %v2628_v41 = vadd.f32 %v4187_v40, %v2626_v39  ;;  %v3782_v40 = vld [vmem:[%s4415_s9 + $0x8] sm:$0xf0] }
 0xaa8   : > { %2792 = vmatpush.bf16.msrb.mxu0 %v3793_v32  ;;  %v3785_v43 = vor.u32 %v4053_v36, %v3782_v40 }
 0xaa9   : > { %2631 = vadd.xlane.f32.xlu2 %v2628_v41 }
 0xaac   : > { %2793 = vmatpush.bf16.msrb.mxu0 %v3785_v43 }
 0xb14   : > { %v2630_v4 = vpop.xlane.xlu1 %2629 }
 0xb15   : > { %v2640_v42 = vmul.f32 %v4673_v30, %v2630_v4 }
 0xb17   : > { %v4676_v35 = vsub.f32 %v2627_v34, %v2640_v42  ;;  %v4054_v34 = vld [vmem:[%s4415_s9 + $0x4] sm:$0xf0] }
 0xb18   : > { %v3781_v39 = vor.u32 %v4054_v34, %v3780_v33 }
 0xb19   : > { %v2644_v47 = vmul.f32 %v4676_v35, %v4676_v35 }
 0xb1a   : > { %2779 = vmatpush.bf16.msrb.mxu3 %v3781_v39 }
 0xb1b   : > { %2646 = vadd.xlane.f32.xlu0 %v2644_v47 }
 0xb1c   : > { %v2632_v48 = vpop.xlane.xlu2 %2631 }
 0xb1d   : > { %v2641_v49 = vmul.f32 %v4673_v30, %v2632_v48 }
 0xb1f   : > { %v4681_v50 = vsub.f32 %v2628_v41, %v2641_v49 }
 0xb21   : > { %v2645_v51 = vmul.f32 %v4681_v50, %v4681_v50 }
 0xb23   : > { %2648 = vadd.xlane.f32.xlu1 %v2645_v51 }
 0xb8e   : > { %v2647_v37 = vpop.xlane.xlu0 %2646 }
 0xb8f   : > { %v2650_v41 = vmul.f32 %v2647_v37, %v4673_v30 }
 0xb91   : > { %v2652_v44 = vadd.f32 1e-12, %v2650_v41 }
 0xb93   : > { %4170 = vrsqrt.f32 %v2652_v44  ;;  %vm2660_vm12 = vweird.f32 %v2652_v44 }
 0xb96   : > { %v2649_v45 = vpop.xlane.xlu1 %2648 }
 0xb97   : > { %v2651_v46 = vmul.f32 %v2649_v45, %v4673_v30 }
 0xb99   : > { %v4171_v3 = vpop.eup %4170  ;;  %v2653_v38 = vadd.f32 1e-12, %v2651_v46 }
 0xb9a   : > { %v2655_v4 = vmul.f32 %v4171_v3, %v2652_v44  ;;  %vm2661_vm11 = vweird.f32 %v4171_v3 }
 0xb9b   : > { %4172 = vrsqrt.f32 %v2653_v38  ;;  %vm2662_vm13 = vmor %vm2660_vm12, %vm2661_vm11  ;;  %vm2670_vm15 = vweird.f32 %v2653_v38 }
 0xb9c   : > { %v2656_v42 = vmul.f32 %v4171_v3, %v2655_v4 }
 0xb9e   : > { %v2657_v47 = vmul.f32 0.5, %v2656_v42 }
 0xba0   : > { %v2658_v48 = vsub.f32 1.5, %v2657_v47 }
 0xba1   : > { %v4173_v49 = vpop.eup %4172 }
 0xba2   : > { %v2659_v51 = vmul.f32 %v4171_v3, %v2658_v48  ;;  %v2665_v52 = vmul.f32 %v4173_v49, %v2653_v38  ;;  %vm2671_vm14 = vweird.f32 %v4173_v49 }
 0xba3   : > { %vm2672_vm0 = vmor %vm2670_vm15, %vm2671_vm14 }
 0xba4   : > { %v2666_v53 = vmul.f32 %v4173_v49, %v2665_v52  ;;  %v2663_v54 = vsel %vm2662_vm13, %v4171_v3, %v2659_v51 }
 0xba5   : > { %v2674_v56 = vmul.f32 %v2663_v54, %v4676_v35  ;;  %v4132_v35 = vld [vmem:[%s4878_s0] ss:$0 sm:$0xff] }
 0xba6   : > { %v2667_v20 = vmul.f32 0.5, %v2666_v53 }
 0xba7   : > { %v2679_v61 = vmul.f32 %v4131_v57, %v2674_v56 }
 0xba8   : > { %v2668_v55 = vsub.f32 1.5, %v2667_v20 }
 0xba9   : > { %v4731_v31 = vadd.f32 %v4132_v35, %v2679_v61 }
 0xbaa   : > { %v2669_v58 = vmul.f32 %v4173_v49, %v2668_v55 }
 0xbac   : > { %v2673_v59 = vsel %vm2672_vm0, %v4173_v49, %v2669_v58 }
 0xbad   : > { %v2675_v60 = vmul.f32 %v2673_v59, %v4681_v50  ;;  %v4084_v50 = vld [vmem:[%s4426_s7 + $0x78] sm:$0xff] }
 0xbae   : > { %2951 = vmatpush.bf16.msrb.mxu2 %v4084_v50 }
 0xbaf   : > { %v2680_v62 = vmul.f32 %v4131_v57, %v2675_v60 }
 0xbb1   : > { %v4733_v0 = vadd.f32 %v4132_v35, %v2680_v62 }
 0xbb2   : > { %2952 = vmatpush.bf16.msrb.mxu2 %v4083_v2 }
 0xbb3   : > { %v2686_v1 = vpack.c.bf16 %v4733_v0, %v4731_v31 }
 0xbb5   : > { %2780 = vmatmul.bf16.vlgmr.msrb.gmra.mxu3 %v2686_v1  ;;  %2794 = vmatmul.bf16.vlgmr.msrb.gmra.mxu0 %v2686_v1 }
 0xbb6   : > { %2953 = vmatpush.bf16.msrb.mxu2 %v4082_v63 }
 0xbba   : > { %2954 = vmatpush.bf16.msrb.mxu2 %v4081_v7 }
 0xbbe   : > { %2955 = vmatpush.bf16.msrb.mxu2 %v4080_v9 }
 0xbc2   : > { %2956 = vmatpush.bf16.msrb.mxu2 %v4079_v11 }
 0xbc6   : > { %2957 = vmatpush.bf16.msrb.mxu2 %v4078_v13 }
 0xbca   : > { %2958 = vmatpush.bf16.msrb.mxu2 %v4077_v16 }
 0xc32   : > { %v2795_v19 = vpop.f32.mrf.mxu0 }
 0xc33   : > { %v2796_v21 = vadd.f32 %v2795_v19, %v2689_v17 }
 0xc35   : > { %v2805_v23 = vmul.f32 0.044715, %v2796_v21  ;;  %v2801_v20 = vmul.f32 0.5, %v2796_v21 }
 0xc37   : > { %v2809_v25 = vmul.f32 %v2805_v23, %v2796_v21 }
 0xc38   : > { %v2781_v26 = vpop.f32.mrf.mxu3 }
 0xc39   : > { %v2813_v27 = vmul.f32 %v2809_v25, %v2796_v21  ;;  %v2782_v28 = vadd.f32 %v2781_v26, %v2688_v24 }
 0xc3a   : > { %v2797_v29 = vpop.f32.mrf.mxu0 }
 0xc3b   : > { %v2817_v32 = vadd.f32 %v2813_v27, %v2796_v21  ;;  %v2804_v33 = vmul.f32 0.044715, %v2782_v28  ;;  %v2798_v34 = vadd.f32 %v2797_v29, %v2689_v17  ;;  %v2800_v62 = vmul.f32 0.5, %v2782_v28 }
 0xc3d   : > { %v2808_v36 = vmul.f32 %v2804_v33, %v2782_v28  ;;  %v2807_v37 = vmul.f32 0.044715, %v2798_v34  ;;  %v2821_v39 = vmul.f32 0.7978846, %v2817_v32  ;;  %v2803_v55 = vmul.f32 0.5, %v2798_v34 }
 0xc3f   : > { %v2812_v40 = vmul.f32 %v2808_v36, %v2782_v28  ;;  %v2811_v41 = vmul.f32 %v2807_v37, %v2798_v34  ;;  %4174 = vtanh.f32 %v2821_v39 }
 0xc40   : > { %v2783_v43 = vpop.f32.mrf.mxu3 }
 0xc41   : > { %v2816_v44 = vadd.f32 %v2812_v40, %v2782_v28  ;;  %v2815_v45 = vmul.f32 %v2811_v41, %v2798_v34  ;;  %v2784_v46 = vadd.f32 %v2783_v43, %v2688_v24  ;;  %v4134_v43 = vld [vmem:[%s918_s8] ss:$0 sm:$0xff]  ;;  %s4879_s8 = sld [smem:[#allocation7_spill]] }
 0xc43   : > { %v2819_v3 = vadd.f32 %v2815_v45, %v2798_v34  ;;  %v2806_v38 = vmul.f32 0.044715, %v2784_v46  ;;  %v2820_v4 = vmul.f32 0.7978846, %v2816_v44  ;;  %v2802_v1 = vmul.f32 0.5, %v2784_v46 }
 0xc44   : > { %v4135_v45 = vld [vmem:[%s921_s14] ss:$0 sm:$0xff] }
 0xc45   : > { %v2823_v42 = vmul.f32 0.7978846, %v2819_v3  ;;  %v2810_v47 = vmul.f32 %v2806_v38, %v2784_v46  ;;  %v4175_v49 = vpop.eup %4174 }
 0xc46   : > { %v2829_v53 = vadd.f32 1.0, %v4175_v49 }
 0xc47   : > { %v2814_v48 = vmul.f32 %v2810_v47, %v2784_v46  ;;  %4176 = vtanh.f32 %v2823_v42  ;;  %p3906_p5 = scmp.ne.s32.totalorder %s4879_s8, 1 }
 0xc48   : > { %4178 = vtanh.f32 %v2820_v4  ;;  %v2833_v58 = vmul.f32 %v2829_v53, %v2801_v20  ;;  %s4880_s3 = sld [smem:[#allocation23_spill]] (!%p3906_p5) }
 0xc49   : > { %v2818_v51 = vadd.f32 %v2814_v48, %v2784_v46  ;;  %s4882_s27 = sld [smem:[#allocation24_spill]] (!%p3906_p5) }
 0xc4b   : > { %v2822_v52 = vmul.f32 0.7978846, %v2818_v51 }
 0xc4d   : > { %v4177_v54 = vpop.eup %4176  ;;  %4180 = vtanh.f32 %v2822_v52 }
 0xc4e   : > { %v2831_v56 = vadd.f32 1.0, %v4177_v54  ;;  %v4179_v57 = vpop.eup %4178  ;;  %s4881_s4 = smov (!%p3906_p5), %s4880_s3 }
 0xc4f   : > { %v2828_v61 = vadd.f32 1.0, %v4179_v57 }
 0xc50   : > { %v2835_v59 = vmul.f32 %v2831_v56, %v2803_v55 }
 0xc51   : > { %v2832_v2 = vmul.f32 %v2828_v61, %v2800_v62 }
 0xc52   : > { %v2837_v60 = vpack.c.bf16 %v2835_v59, %v2833_v58 }
 0xc53   : > { %v4181_v35 = vpop.eup %4180 }
 0xc54   : > { %2959 = vmatmul.bf16.vlgmr.msrb.gmra.mxu2 %v2837_v60  ;;  %v2830_v50 = vadd.f32 1.0, %v4181_v35 }
 0xc56   : > { %v2834_v5 = vmul.f32 %v2830_v50, %v2802_v1 }
 0xc58   : > { %v2836_v63 = vpack.c.bf16 %v2834_v5, %v2832_v2 }
 0xc5a   : > { %2945 = vmatmul.bf16.vlgmr.msrb.gmra.mxu1 %v2836_v63 }
 0xcd7   : > { %v2946_v7 = vpop.f32.mrf.mxu1  ;;  %v2960_v8 = vpop.f32.mrf.mxu2 }
 0xcd8   : > { %v2947_v9 = vadd.f32 %v4133_v6, %v2946_v7 }
 0xcda   : > { %v2961_v10 = vadd.f32 %v2960_v8, %v2947_v9 }
 0xcdc   : > { %v2965_v11 = vadd.f32 %v2961_v10, %v4731_v31 }
 0xcde   : > { %2967 = vadd.xlane.f32.xlu2 %v2965_v11 }
 0xcdf   : > { %v2948_v12 = vpop.f32.mrf.mxu1  ;;  %v2962_v14 = vpop.f32.mrf.mxu2 }
 0xce0   : > { %v2949_v13 = vadd.f32 %v4133_v6, %v2948_v12 }
 0xce2   : > { %v2963_v15 = vadd.f32 %v2962_v14, %v2949_v13 }
 0xce4   : > { %v2966_v16 = vadd.f32 %v2963_v15, %v4733_v0 }
 0xce6   : > { %2969 = vadd.xlane.f32.xlu0 %v2966_v16 }
 0xd51   : > { %v2968_v17 = vpop.xlane.xlu2 %2967 }
 0xd52   : > { %v2971_v18 = vmul.f32 %v2968_v17, %v4673_v30 }
 0xd54   : > { %v2973_v19 = vsub.f32 %v2965_v11, %v2971_v18 }
 0xd56   : > { %v2975_v21 = vmul.f32 %v2973_v19, %v2973_v19 }
 0xd58   : > { %2977 = vadd.xlane.f32.xlu1 %v2975_v21 }
 0xd59   : > { %v2970_v22 = vpop.xlane.xlu0 %2969 }
 0xd5a   : > { %v2972_v23 = vmul.f32 %v2970_v22, %v4673_v30 }
 0xd5c   : > { %v2974_v24 = vsub.f32 %v2966_v16, %v2972_v23 }
 0xd5e   : > { %v2976_v25 = vmul.f32 %v2974_v24, %v2974_v24 }
 0xd60   : > { %2979 = vadd.xlane.f32.xlu2 %v2976_v25 }
 0xdcb   : > { %v2978_v31 = vpop.xlane.xlu1 %2977 }
 0xdcc   : > { %v2981_v26 = vmul.f32 %v2978_v31, %v4673_v30 }
 0xdce   : > { %v2983_v27 = vadd.f32 1e-12, %v2981_v26 }
 0xdd0   : > { %4182 = vrsqrt.f32 %v2983_v27  ;;  %vm2991_vm2 = vweird.f32 %v2983_v27 }
 0xdd3   : > { %v2980_v0 = vpop.xlane.xlu2 %2979 }
 0xdd4   : > { %v2982_v28 = vmul.f32 %v2980_v0, %v4673_v30 }
 0xdd6   : > { %v4183_v29 = vpop.eup %4182  ;;  %v2984_v32 = vadd.f32 1e-12, %v2982_v28 }
 0xdd7   : > { %v2986_v33 = vmul.f32 %v4183_v29, %v2983_v27  ;;  %vm2992_vm1 = vweird.f32 %v4183_v29 }
 0xdd8   : > { %4184 = vrsqrt.f32 %v2984_v32  ;;  %vm2993_vm3 = vmor %vm2991_vm2, %vm2992_vm1  ;;  %vm3001_vm5 = vweird.f32 %v2984_v32 }
 0xdd9   : > { %v2987_v34 = vmul.f32 %v4183_v29, %v2986_v33 }
 0xddb   : > { %v2988_v36 = vmul.f32 0.5, %v2987_v34 }
 0xddd   : > { %v2989_v37 = vsub.f32 1.5, %v2988_v36 }
 0xdde   : > { %v4185_v39 = vpop.eup %4184 }
 0xddf   : > { %v2990_v40 = vmul.f32 %v4183_v29, %v2989_v37  ;;  %v2996_v41 = vmul.f32 %v4185_v39, %v2984_v32  ;;  %vm3002_vm4 = vweird.f32 %v4185_v39 }
 0xde0   : > { %vm3003_vm6 = vmor %vm3001_vm5, %vm3002_vm4 }
 0xde1   : > { %v2994_v30 = vsel %vm2993_vm3, %v4183_v29, %v2990_v40  ;;  %v2997_v44 = vmul.f32 %v4185_v39, %v2996_v41 }
 0xde2   : > { %v3005_v46 = vmul.f32 %v2994_v30, %v2973_v19 }
 0xde3   : > { %v2998_v3 = vmul.f32 0.5, %v2997_v44 }
 0xde4   : > { %v3010_v38 = vmul.f32 %v4134_v43, %v3005_v46 }
 0xde5   : > { %v2999_v4 = vsub.f32 1.5, %v2998_v3 }
 0xde6   : > { %v3015_v42 = vadd.f32 %v4135_v45, %v3010_v38 }
 0xde7   : > { %v3000_v47 = vmul.f32 %v4185_v39, %v2999_v4 }
 0xde8   : > { %3017 = vst [vmem:[#allocation2] sm:$0xff] %v3015_v42 }
 0xde9   : > { %v3004_v48 = vsel %vm3003_vm6, %v4185_v39, %v3000_v47 }
 0xdea   : > { %v3006_v49 = vmul.f32 %v3004_v48, %v2974_v24 }
 0xdec   : > { %v3011_v51 = vmul.f32 %v4134_v43, %v3006_v49  ;;  %3022 = sbr.rel (%p3906_p5) target bundleno = 3735 (0xe97), region = 116 }
 0xdee   : > { %v3016_v52 = vadd.f32 %v4135_v45, %v3011_v51 }
 0xdf0   : > { %3018 = vst [vmem:[#allocation2 + $0x8] sm:$0xff] %v3016_v52 }
 0xdf1   : > { %v4092_v53 = vld [vmem:[%s4880_s3 + $0x38] sm:$0xff]  ;;  %v4091_v54 = vld [vmem:[%s4881_s4 + $0x30] sm:$0xff]  ;;  %v4090_v20 = vld [vmem:[%s4881_s4 + $0x28] sm:$0xff]  ;;  %v3024_v59 = vrot.slane %v3016_v52, 7  ;;  %vm3026_vm7 = vcmask 1040384  }
 0xdf2   : > { %3097 = vmatpush.bf16.msra.mxu0 %v4092_v53  ;;  %v4089_v55 = vld [vmem:[%s4881_s4 + $0x20] sm:$0xff]  ;;  %v4088_v56 = vld [vmem:[%s4881_s4 + $0x18] sm:$0xff]  ;;  %v4087_v57 = vld [vmem:[%s4881_s4 + $0x10] sm:$0xff] }
 0xdf3   : > { %v4086_v58 = vld [vmem:[%s4881_s4 + $0x8] sm:$0xff]  ;;  %v4085_v60 = vld [vmem:[%s4881_s4] sm:$0xff]  ;;  %v3027_v61 = vsel %vm3026_vm7, %v3015_v42, %v3024_v59 }
 0xdf4   : > { %v3028_v35 = vpack.c.bf16 %v3027_v61, %v3027_v61  ;;  %v4188_v62 = vld [vmem:[%s4882_s27] ss:$0 sm:$0xff] }
 0xdf6   : > { %3098 = vmatpush.bf16.msra.mxu0 %v4091_v54 }
 0xdfa   : > { %3099 = vmatpush.bf16.msra.mxu0 %v4090_v20 }
 0xdfe   : > { %3100 = vmatpush.bf16.msra.mxu0 %v4089_v55 }
 0xe02   : > { %3101 = vmatpush.bf16.msra.mxu0 %v4088_v56 }
 0xe06   : > { %3102 = vmatpush.bf16.msra.mxu0 %v4087_v57 }
 0xe0a   : > { %3103 = vmatpush.bf16.msra.mxu0 %v4086_v58 }
 0xe0e   : > { %3104 = vmatpush.bf16.msra.mxu0 %v4085_v60 }
 0xe11   : > { %3105 = vmatmul.bf16.vlgmr.msra.gmra.mxu0 %v3028_v35 }
 0xe8e   : > { %v3106_v1 = vpop.f32.mrf.mxu0 }
 0xe8f   : > { %v3107_v50 = vadd.f32 %v4188_v62, %v3106_v1 }
 0xe91   : > { %3110 = vst [vmem:[#allocation3] sm:$0x3] %v3107_v50 }
 0xe96   : > { %v3108_v2 = vpop.f32.mrf.mxu0 }
 0xe97 PF: > { %s4883_s8 = sld [smem:[#allocation7_spill]]  ;;  %s4231_s29 = smov [#allocation3]  }
 0xe98   : > { %s3117_s14 = sshll.u32 %s4231_s29, 4  ;;  %s4884_s10 = sld [smem:[#allocation25_spill]]  ;;  %s3118_s14 = int_to_ptr.vmem [resolvable:$true] %s3117_s14 }
 0xe9d   : > { %p4097_p6 = scmp.eq.s32.totalorder %s4883_s8, 1 }
 0xe9e   : > { %s3119_s5 = sshll.u32 %s4884_s10, 4  ;;  %s3120_s5 = int_to_ptr.hbm [resolvable:$true] %s3119_s5 }
 0xe9f   : > { %4094 = dma.vmem_to_hbm [thread:$0]  (%p4097_p6), %s3118_s14, 32, %s3120_s5, [#allocation4]  }
 0xea0   : > { %4222 = dma.done.wait (%p4097_p6), [#allocation4], 32  }
 0xea1   : > { %4224 = vsyncadd (%p4097_p6), [#allocation4], 4294967264 }
 0xea2 PF: > { %s4885_s1 = sld [smem:[#allocation6_spill]] }
 0xea8   : > { %s33_s3 = sadd.s32 1, %s4885_s1  }
 0xea9   : > { %p30_p7 = scmp.ge.s32.totalorder %s33_s3, 4  }
 0xeab   :  { %32 = sbr.rel (!%p30_p7) target bundleno = 17 (0x11), region = 188 }
 0xeb0   :  { %3133 = vsyncpa [#allocation4], 1 }
 0xeb1   :  { %3135 = vsyncpa [#allocation4 + $0x1], 1 }

</bundles_post_ra>
